<compile_context>
chip_gen: v7x
topology: tpu7x:2x2x1
jax: 0.10.0
libtpu: 0.0.40
codegen_flags: <defaults>
</compile_context>

<pallas_src>
import numpy as np
import jax
import jax.numpy as jnp
from jax import lax
from jax.experimental import pallas as pl
from jax.experimental.pallas import tpu as pltpu

# ---- constants baked into the PyTorch module ----
STEPS = 32
N_EVENTS = STEPS * 7              # 224
PADDED_LEN = 256                  # Reduce pads the sequence to 256
PAD_LEFT = 3                      # zero padding of the (k=7, s=4, p=3) convs
VALID_OFF = 8                     # sublane-aligned staging offset inside each block
TAP_BASE = VALID_OFF - PAD_LEFT   # 5: tap-k stride-4 gather starts at row 5+k
ROW_BLOCK = VALID_OFF + PADDED_LEN  # 264 rows per batch block (multiple of 8)
KSIZE = 7
BN_EPS = 1e-5
LRELU_SLOPE = 0.2


def _bn_lrelu(y, gamma, beta):
    """Training-mode BatchNorm1d over all (batch*length) rows + LeakyReLU(0.2).

    Single-pass stats folded into one scale+shift pass; var clamped at 0 to guard
    against cancellation in E[x^2] - mean^2.
    """
    inv_n = 1.0 / y.shape[0]
    mean = jnp.sum(y, axis=0, keepdims=True) * inv_n
    var = jnp.sum(y * y, axis=0, keepdims=True) * inv_n - mean * mean
    var = jnp.maximum(var, 0.0)
    scale = gamma * lax.rsqrt(var + BN_EPS)                 # (1, C)
    shift = beta - mean * scale                             # (1, C)
    z = y * scale + shift
    return jnp.where(z > 0, z, LRELU_SLOPE * z)


def _discriminator_kernel(x_ref, embw_ref, p_ref, convw_ref, w4_ref, b4_ref,
                          out_ref, hbuf_ref):
    batch = hbuf_ref.shape[0]
    dim = hbuf_ref.shape[2]

    # ---- packed (10, D) small-parameter stack, sliced here ----
    emb_b = p_ref[0:1, :]
    b1, gm1, bt1 = p_ref[1:2, :], p_ref[2:3, :], p_ref[3:4, :]
    b2, gm2, bt2 = p_ref[4:5, :], p_ref[5:6, :], p_ref[6:7, :]
    b3, gm3, bt3 = p_ref[7:8, :], p_ref[8:9, :], p_ref[9:10, :]

    # ---- fused embedding: one matmul against the block-diagonal weight ----
    # (kept f32: K = 2 + n_atoms is tiny, and it preserves the pos/amp precision)
    emb = jnp.dot(x_ref[...], embw_ref[...],
                  preferred_element_type=jnp.float32) + emb_b     # (B*224, D)

    # ---- zero ONLY the pad rows (left conv pad + pad-to-256 tail) ----
    # Valid rows 8..231 are fully overwritten below; rows past 263 are never read.
    hbuf_ref[:, pl.ds(0, VALID_OFF), :] = jnp.zeros(
        (batch, VALID_OFF, dim), hbuf_ref.dtype)
    hbuf_ref[:, pl.ds(VALID_OFF + N_EVENTS, PADDED_LEN - N_EVENTS), :] = jnp.zeros(
        (batch, PADDED_LEN - N_EVENTS, dim), hbuf_ref.dtype)

    # ---- stage embeddings at sublane-aligned offset 8 (batch-folded store) ----
    hbuf_ref[:, pl.ds(VALID_OFF, N_EVENTS), :] = emb.reshape(batch, N_EVENTS, dim)

    # Conv weights arrive stacked & pre-flattened as (3, 7*D, D); cast once to bf16.
    w1 = convw_ref[0].astype(jnp.bfloat16)
    w2 = convw_ref[1].astype(jnp.bfloat16)
    w3 = convw_ref[2].astype(jnp.bfloat16)

    def gather(l_out):
        # Batch-folded stride-4 sublane tap gather -> (B, l_out, 7*D).
        # Tap k of output t for batch b lives at scratch row TAP_BASE + k + 4*t.
        taps = [hbuf_ref[:, pl.ds(TAP_BASE + k, l_out, stride=4), :]
                for k in range(KSIZE)]
        return jnp.concatenate(taps, axis=2)

    def conv_block(l_out, w, b, gamma, beta):
        # l_out is a multiple of 8 here, so the merge of (B, l_out) is tile-aligned.
        g = gather(l_out).reshape(batch * l_out, KSIZE * dim).astype(jnp.bfloat16)
        y = jnp.dot(g, w, preferred_element_type=jnp.float32) + b
        return _bn_lrelu(y, gamma, beta)                     # (B*l_out, D) f32

    # layer 1: length 256 -> 64
    y = conv_block(64, w1, b1, gm1, bt1)
    hbuf_ref[:, pl.ds(VALID_OFF, 64), :] = y.reshape(batch, 64, dim)
    # layer 2: length 64 -> 16
    y = conv_block(16, w2, b2, gm2, bt2)
    hbuf_ref[:, pl.ds(VALID_OFF, 16), :] = y.reshape(batch, 16, dim)

    # layer 3: length 16 -> 4.  l_out=4 is not sublane-aligned, so keep a tiny
    # per-batch assembly (value slices, no ref reshape); negligible at this size.
    taps3 = gather(4)                                        # (B, 4, 7*D) value
    g3 = jnp.concatenate([taps3[b] for b in range(batch)],
                         axis=0).astype(jnp.bfloat16)        # (B*4, 7*D)
    y = _bn_lrelu(jnp.dot(g3, w3, preferred_element_type=jnp.float32) + b3,
                  gm3, bt3)                                  # (B*4, D) f32

    # ---- final Conv1d(D, out_dim, 4, 4, 0): flatten the 4 positions into lanes ----
    g4 = jnp.concatenate(
        [jnp.concatenate([y[b * 4 + j: b * 4 + j + 1, :] for j in range(4)], axis=1)
         for b in range(batch)], axis=0)                     # (B, 4*D) f32
    out_ref[...] = jnp.dot(g4, w4_ref[...],
                           preferred_element_type=jnp.float32) + b4_ref[...]


def discriminator_forward(x, params):
    batch, n_ev, in_feat = x.shape
    assert n_ev == N_EVENTS
    dim = params["w1"].shape[1]
    half = dim // 2
    out_dim = params["w4"].shape[2]

    # ---- host-side layout plumbing ----
    x_flat = x.reshape(batch * N_EVENTS, in_feat)            # (B*224, 2+n_atoms)

    # Fused block-diagonal embedding weight + concatenated bias.
    emb_w = jnp.zeros((in_feat, dim), jnp.float32)
    emb_w = emb_w.at[0:2, 0:half].set(params["wpa"])
    emb_w = emb_w.at[2:, half:].set(params["wat"])

    # All (1, D) params packed into a single (10, D) operand (one DMA, one tile).
    p_stack = jnp.concatenate(
        [jnp.concatenate([params["bpa"], params["bat"]], axis=1),
         params["b1"], params["g1"], params["be1"],
         params["b2"], params["g2"], params["be2"],
         params["b3"], params["g3"], params["be3"]], axis=0)

    # Three conv weights flattened to (7*D, D) and stacked into one operand.
    conv_w = jnp.stack([params["w1"].reshape(KSIZE * dim, dim),
                        params["w2"].reshape(KSIZE * dim, dim),
                        params["w3"].reshape(KSIZE * dim, dim)], axis=0)
    w4f = params["w4"].reshape(4 * dim, out_dim)

    operands = (x_flat, emb_w, p_stack, conv_w, w4f, params["b4"])
    vmem = pl.BlockSpec(memory_space=pltpu.MemorySpace.VMEM)
    return pl.pallas_call(
        _discriminator_kernel,
        out_shape=jax.ShapeDtypeStruct((batch, out_dim), jnp.float32),
        in_specs=[vmem] * len(operands),
        out_specs=vmem,
        # Per-batch zero-padded staging block (f32; see header note on bf16).
        scratch_shapes=[pltpu.VMEM((batch, ROW_BLOCK, dim), jnp.float32)],
    )(*operands)


def init_params(key, n_atoms, dim, out_dim):
    """Deterministic synthetic init (weights ~ N(0, 0.02), matching weight_init=0.02)."""
    ks = jax.random.split(key, 20)
    w = lambda k, shape: (0.02 * jax.random.normal(k, shape)).astype(jnp.float32)
    half = dim // 2
    p = {}
    # Linear weights stored pre-transposed: (in_features, out_features).
    p["wpa"] = w(ks[0], (2, half));        p["bpa"] = w(ks[1], (1, half))
    p["wat"] = w(ks[2], (n_atoms, half));  p["bat"] = w(ks[3], (1, half))
    # Conv weights stored as (ksize, C_in, C_out); torch layout is (C_out, C_in, k).
    p["w1"] = w(ks[4], (7, dim, dim));     p["b1"] = w(ks[5], (1, dim))
    p["w2"] = w(ks[6], (7, dim, dim));     p["b2"] = w(ks[7], (1, dim))
    p["w3"] = w(ks[8], (7, dim, dim));     p["b3"] = w(ks[9], (1, dim))
    p["w4"] = w(ks[10], (4, dim, out_dim)); p["b4"] = w(ks[11], (1, out_dim))
    # BatchNorm affine params.
    p["g1"] = (1.0 + 0.02 * jax.random.normal(ks[12], (1, dim))).astype(jnp.float32)
    p["g2"] = (1.0 + 0.02 * jax.random.normal(ks[13], (1, dim))).astype(jnp.float32)
    p["g3"] = (1.0 + 0.02 * jax.random.normal(ks[14], (1, dim))).astype(jnp.float32)
    p["be1"] = w(ks[15], (1, dim))
    p["be2"] = w(ks[16], (1, dim))
    p["be3"] = w(ks[17], (1, dim))
    return p


def reference_forward(x, params):
    """Plain-JAX reference (lax.conv) used to validate the Pallas kernel."""
    pa = x[:, :, :2] @ params["wpa"] + params["bpa"]
    at = x[:, :, 2:] @ params["wat"] + params["bat"]
    h = jnp.concatenate([pa, at], axis=-1)              # (B, n_events, D)
    h = jnp.transpose(h, (0, 2, 1))                     # (B, D, n_events)
    h = jnp.pad(h, ((0, 0), (0, 0), (0, PADDED_LEN - h.shape[-1])))

    def conv1d(h, w, b, stride, pad):
        w_oiw = jnp.transpose(w, (2, 1, 0))             # (C_out, C_in, k)
        y = lax.conv_general_dilated(
            h, w_oiw, window_strides=(stride,), padding=[(pad, pad)],
            dimension_numbers=("NCH", "OIH", "NCH"),
            precision=lax.Precision.HIGHEST)
        return y + b[0][None, :, None]

    def bn_lrelu(h, g, be):
        mean = jnp.mean(h, axis=(0, 2), keepdims=True)
        var = jnp.mean((h - mean) ** 2, axis=(0, 2), keepdims=True)
        y = (h - mean) * lax.rsqrt(var + BN_EPS) * g[0][None, :, None] \
            + be[0][None, :, None]
        return jnp.where(y > 0, y, LRELU_SLOPE * y)

    h = bn_lrelu(conv1d(h, params["w1"], params["b1"], 4, 3), params["g1"], params["be1"])
    h = bn_lrelu(conv1d(h, params["w2"], params["b2"], 4, 3), params["g2"], params["be2"])
    h = bn_lrelu(conv1d(h, params["w3"], params["b3"], 4, 3), params["g3"], params["be3"])
    h = conv1d(h, params["w4"], params["b4"], 4, 0)     # (B, out_dim, 1)
    return h[:, :, 0]


if __name__ == "__main__":
    # Small synthetic configuration (n_events is fixed at 224 by the module).
    n_atoms = 16
    internal_dim = 32
    out_dim = 1
    batch = 2

    key = jax.random.PRNGKey(0)
    k_x, k_p = jax.random.split(key)
    x = jax.random.normal(k_x, (batch, N_EVENTS, 2 + n_atoms), dtype=jnp.float32)
    params = init_params(k_p, n_atoms, internal_dim, out_dim)

    out = jax.block_until_ready(discriminator_forward(x, params))
    assert out.shape == (batch, out_dim), out.shape

    ref = jax.block_until_ready(reference_forward(x, params))
    # Tolerance covers the bf16 conv-matmul operands (f32 accumulation) in the kernel.
    np.testing.assert_allclose(np.asarray(out), np.asarray(ref), rtol=5e-2, atol=2e-2)

    print("KERNEL_OK")
</pallas_src>

<mosaic_0001>
module attributes {stable_mosaic.version = 11 : i64} {
  func.func @_discriminator_kernel(%arg0: memref<448x18xf32, #tpu.memory_space<vmem>>, %arg1: memref<18x32xf32, #tpu.memory_space<vmem>>, %arg2: memref<10x32xf32, #tpu.memory_space<vmem>>, %arg3: memref<3x224x32xf32, #tpu.memory_space<vmem>>, %arg4: memref<128x1xf32, #tpu.memory_space<vmem>>, %arg5: memref<1x1xf32, #tpu.memory_space<vmem>>, %arg6: memref<2x1xf32, #tpu.memory_space<vmem>>, %arg7: memref<2x264x32xf32, #tpu.memory_space<vmem>>) attributes {dimension_semantics = [], scalar_prefetch = 0 : i64, scratch_operands = 1 : i64, tpu.core_type = #tpu.core_type<tc>} {
    %c0 = arith.constant 0 : index
    %c0_0 = arith.constant 0 : index
    %0 = vector.load %arg2[%c0, %c0_0] : memref<10x32xf32, #tpu.memory_space<vmem>>, vector<1x32xf32>
    %c1 = arith.constant 1 : index
    %c0_1 = arith.constant 0 : index
    %1 = vector.load %arg2[%c1, %c0_1] : memref<10x32xf32, #tpu.memory_space<vmem>>, vector<1x32xf32>
    %c2 = arith.constant 2 : index
    %c0_2 = arith.constant 0 : index
    %2 = vector.load %arg2[%c2, %c0_2] : memref<10x32xf32, #tpu.memory_space<vmem>>, vector<1x32xf32>
    %c3 = arith.constant 3 : index
    %c0_3 = arith.constant 0 : index
    %3 = vector.load %arg2[%c3, %c0_3] : memref<10x32xf32, #tpu.memory_space<vmem>>, vector<1x32xf32>
    %c4 = arith.constant 4 : index
    %c0_4 = arith.constant 0 : index
    %4 = vector.load %arg2[%c4, %c0_4] : memref<10x32xf32, #tpu.memory_space<vmem>>, vector<1x32xf32>
    %c5 = arith.constant 5 : index
    %c0_5 = arith.constant 0 : index
    %5 = vector.load %arg2[%c5, %c0_5] : memref<10x32xf32, #tpu.memory_space<vmem>>, vector<1x32xf32>
    %c6 = arith.constant 6 : index
    %c0_6 = arith.constant 0 : index
    %6 = vector.load %arg2[%c6, %c0_6] : memref<10x32xf32, #tpu.memory_space<vmem>>, vector<1x32xf32>
    %c7 = arith.constant 7 : index
    %c0_7 = arith.constant 0 : index
    %7 = vector.load %arg2[%c7, %c0_7] : memref<10x32xf32, #tpu.memory_space<vmem>>, vector<1x32xf32>
    %c8 = arith.constant 8 : index
    %c0_8 = arith.constant 0 : index
    %8 = vector.load %arg2[%c8, %c0_8] : memref<10x32xf32, #tpu.memory_space<vmem>>, vector<1x32xf32>
    %c9 = arith.constant 9 : index
    %c0_9 = arith.constant 0 : index
    %9 = vector.load %arg2[%c9, %c0_9] : memref<10x32xf32, #tpu.memory_space<vmem>>, vector<1x32xf32>
    %c0_10 = arith.constant 0 : index
    %c0_11 = arith.constant 0 : index
    %10 = vector.load %arg0[%c0_10, %c0_11] : memref<448x18xf32, #tpu.memory_space<vmem>>, vector<448x18xf32>
    %c0_12 = arith.constant 0 : index
    %c0_13 = arith.constant 0 : index
    %11 = vector.load %arg1[%c0_12, %c0_13] : memref<18x32xf32, #tpu.memory_space<vmem>>, vector<18x32xf32>
    %cst = arith.constant dense<0.000000e+00> : vector<448x32xf32>
    %12 = tpu.matmul %10, %11, %cst {dimension_numbers = #tpu.dot_dimension_numbers<[1], [0], [0], [1], [0, 0, 1, 1], [], []>} : vector<448x18xf32>, vector<18x32xf32>, vector<448x32xf32> -> vector<448x32xf32>
    %13 = vector.broadcast %0 : vector<1x32xf32> to vector<448x32xf32>
    %14 = arith.addf %12, %13 : vector<448x32xf32>
    %cst_14 = arith.constant 0.000000e+00 : f32
    %15 = vector.broadcast %cst_14 : f32 to vector<2x8x32xf32>
    %c0_15 = arith.constant 0 : index
    %c0_16 = arith.constant 0 : index
    %c0_17 = arith.constant 0 : index
    %16 = vector.load %arg7[%c0_15, %c0_16, %c0_17] : memref<2x264x32xf32, #tpu.memory_space<vmem>>, vector<2x8x32xf32>
    tpu.vector_store %arg7[%c0_15, %c0_16, %c0_17], %15 {strides = array<i32>} : memref<2x264x32xf32, #tpu.memory_space<vmem>>, vector<2x8x32xf32>,
    %cst_18 = arith.constant 0.000000e+00 : f32
    %17 = vector.broadcast %cst_18 : f32 to vector<2x32x32xf32>
    %c0_19 = arith.constant 0 : index
    %c232 = arith.constant 232 : index
    %c0_20 = arith.constant 0 : index
    %18 = vector.load %arg7[%c0_19, %c232, %c0_20] : memref<2x264x32xf32, #tpu.memory_space<vmem>>, vector<2x32x32xf32>
    tpu.vector_store %arg7[%c0_19, %c232, %c0_20], %17 {strides = array<i32>} : memref<2x264x32xf32, #tpu.memory_space<vmem>>, vector<2x32x32xf32>,
    %19 = vector.shape_cast %14 : vector<448x32xf32> to vector<2x224x32xf32>
    %c0_21 = arith.constant 0 : index
    %c8_22 = arith.constant 8 : index
    %c0_23 = arith.constant 0 : index
    %20 = vector.load %arg7[%c0_21, %c8_22, %c0_23] : memref<2x264x32xf32, #tpu.memory_space<vmem>>, vector<2x224x32xf32>
    tpu.vector_store %arg7[%c0_21, %c8_22, %c0_23], %19 {strides = array<i32>} : memref<2x264x32xf32, #tpu.memory_space<vmem>>, vector<2x224x32xf32>,
    %c0_24 = arith.constant 0 : index
    %c0_25 = arith.constant 0 : index
    %c0_26 = arith.constant 0 : index
    %21 = vector.load %arg3[%c0_24, %c0_25, %c0_26] : memref<3x224x32xf32, #tpu.memory_space<vmem>>, vector<1x224x32xf32>
    %22 = vector.shape_cast %21 : vector<1x224x32xf32> to vector<224x32xf32>
    %23 = arith.truncf %22 : vector<224x32xf32> to vector<224x32xbf16>
    %c1_27 = arith.constant 1 : index
    %c0_28 = arith.constant 0 : index
    %c0_29 = arith.constant 0 : index
    %24 = vector.load %arg3[%c1_27, %c0_28, %c0_29] : memref<3x224x32xf32, #tpu.memory_space<vmem>>, vector<1x224x32xf32>
    %25 = vector.shape_cast %24 : vector<1x224x32xf32> to vector<224x32xf32>
    %26 = arith.truncf %25 : vector<224x32xf32> to vector<224x32xbf16>
    %c2_30 = arith.constant 2 : index
    %c0_31 = arith.constant 0 : index
    %c0_32 = arith.constant 0 : index
    %27 = vector.load %arg3[%c2_30, %c0_31, %c0_32] : memref<3x224x32xf32, #tpu.memory_space<vmem>>, vector<1x224x32xf32>
    %28 = vector.shape_cast %27 : vector<1x224x32xf32> to vector<224x32xf32>
    %29 = arith.truncf %28 : vector<224x32xf32> to vector<224x32xbf16>
    %c0_33 = arith.constant 0 : index
    %c5_34 = arith.constant 5 : index
    %c0_35 = arith.constant 0 : index
    %30 = tpu.strided_load %arg7[%c0_33, %c5_34, %c0_35] {strides = array<i32: 1, 4, 1>} : memref<2x264x32xf32, #tpu.memory_space<vmem>>, vector<2x64x32xf32>
    %c0_36 = arith.constant 0 : index
    %c6_37 = arith.constant 6 : index
    %c0_38 = arith.constant 0 : index
    %31 = tpu.strided_load %arg7[%c0_36, %c6_37, %c0_38] {strides = array<i32: 1, 4, 1>} : memref<2x264x32xf32, #tpu.memory_space<vmem>>, vector<2x64x32xf32>
    %c0_39 = arith.constant 0 : index
    %c7_40 = arith.constant 7 : index
    %c0_41 = arith.constant 0 : index
    %32 = tpu.strided_load %arg7[%c0_39, %c7_40, %c0_41] {strides = array<i32: 1, 4, 1>} : memref<2x264x32xf32, #tpu.memory_space<vmem>>, vector<2x64x32xf32>
    %c0_42 = arith.constant 0 : index
    %c8_43 = arith.constant 8 : index
    %c0_44 = arith.constant 0 : index
    %33 = tpu.strided_load %arg7[%c0_42, %c8_43, %c0_44] {strides = array<i32: 1, 4, 1>} : memref<2x264x32xf32, #tpu.memory_space<vmem>>, vector<2x64x32xf32>
    %c0_45 = arith.constant 0 : index
    %c9_46 = arith.constant 9 : index
    %c0_47 = arith.constant 0 : index
    %34 = tpu.strided_load %arg7[%c0_45, %c9_46, %c0_47] {strides = array<i32: 1, 4, 1>} : memref<2x264x32xf32, #tpu.memory_space<vmem>>, vector<2x64x32xf32>
    %c0_48 = arith.constant 0 : index
    %c10 = arith.constant 10 : index
    %c0_49 = arith.constant 0 : index
    %35 = tpu.strided_load %arg7[%c0_48, %c10, %c0_49] {strides = array<i32: 1, 4, 1>} : memref<2x264x32xf32, #tpu.memory_space<vmem>>, vector<2x64x32xf32>
    %c0_50 = arith.constant 0 : index
    %c11 = arith.constant 11 : index
    %c0_51 = arith.constant 0 : index
    %36 = tpu.strided_load %arg7[%c0_50, %c11, %c0_51] {strides = array<i32: 1, 4, 1>} : memref<2x264x32xf32, #tpu.memory_space<vmem>>, vector<2x64x32xf32>
    %37 = tpu.concatenate %30, %31, %32, %33, %34, %35, %36 in 2 : vector<2x64x32xf32>, vector<2x64x32xf32>, vector<2x64x32xf32>, vector<2x64x32xf32>, vector<2x64x32xf32>, vector<2x64x32xf32>, vector<2x64x32xf32> -> vector<2x64x224xf32>
    %38 = vector.shape_cast %37 : vector<2x64x224xf32> to vector<128x224xf32>
    %39 = arith.truncf %38 : vector<128x224xf32> to vector<128x224xbf16>
    %cst_52 = arith.constant dense<0.000000e+00> : vector<128x32xf32>
    %40 = tpu.matmul %39, %23, %cst_52 {dimension_numbers = #tpu.dot_dimension_numbers<[1], [0], [0], [1], [0, 0, 1, 1], [], []>} : vector<128x224xbf16>, vector<224x32xbf16>, vector<128x32xf32> -> vector<128x32xf32>
    %41 = vector.broadcast %1 : vector<1x32xf32> to vector<128x32xf32>
    %42 = arith.addf %40, %41 : vector<128x32xf32>
    %cst_53 = arith.constant dense<0.000000e+00> : vector<32xf32>
    %43 = vector.multi_reduction <add>, %42, %cst_53 [0] : vector<128x32xf32> to vector<32xf32>
    %44 = vector.shape_cast %43 : vector<32xf32> to vector<1x32xf32>
    %cst_54 = arith.constant 7.812500e-03 : f32
    %45 = vector.broadcast %cst_54 : f32 to vector<1x32xf32>
    %46 = arith.mulf %44, %45 : vector<1x32xf32>
    %47 = arith.mulf %42, %42 : vector<128x32xf32>
    %cst_55 = arith.constant dense<0.000000e+00> : vector<32xf32>
    %48 = vector.multi_reduction <add>, %47, %cst_55 [0] : vector<128x32xf32> to vector<32xf32>
    %49 = vector.shape_cast %48 : vector<32xf32> to vector<1x32xf32>
    %cst_56 = arith.constant 7.812500e-03 : f32
    %50 = vector.broadcast %cst_56 : f32 to vector<1x32xf32>
    %51 = arith.mulf %49, %50 : vector<1x32xf32>
    %52 = arith.mulf %46, %46 : vector<1x32xf32>
    %53 = arith.subf %51, %52 : vector<1x32xf32>
    %cst_57 = arith.constant 0.000000e+00 : f32
    %54 = vector.broadcast %cst_57 : f32 to vector<1x32xf32>
    %55 = arith.maximumf %53, %54 : vector<1x32xf32>
    %cst_58 = arith.constant 9.99999974E-6 : f32
    %56 = vector.broadcast %cst_58 : f32 to vector<1x32xf32>
    %57 = arith.addf %55, %56 : vector<1x32xf32>
    %58 = math.rsqrt %57 : vector<1x32xf32>
    %59 = arith.mulf %2, %58 : vector<1x32xf32>
    %60 = arith.mulf %46, %59 : vector<1x32xf32>
    %61 = arith.subf %3, %60 : vector<1x32xf32>
    %62 = vector.broadcast %59 : vector<1x32xf32> to vector<128x32xf32>
    %63 = arith.mulf %42, %62 : vector<128x32xf32>
    %64 = vector.broadcast %61 : vector<1x32xf32> to vector<128x32xf32>
    %65 = arith.addf %63, %64 : vector<128x32xf32>
    %cst_59 = arith.constant 0.000000e+00 : f32
    %66 = vector.broadcast %cst_59 : f32 to vector<128x32xf32>
    %67 = arith.cmpf ogt, %65, %66 : vector<128x32xf32>
    %cst_60 = arith.constant 2.000000e-01 : f32
    %68 = vector.broadcast %cst_60 : f32 to vector<128x32xf32>
    %69 = arith.mulf %68, %65 : vector<128x32xf32>
    %70 = arith.select %67, %65, %69 : vector<128x32xi1>, vector<128x32xf32>
    %71 = vector.shape_cast %70 : vector<128x32xf32> to vector<2x64x32xf32>
    %c0_61 = arith.constant 0 : index
    %c8_62 = arith.constant 8 : index
    %c0_63 = arith.constant 0 : index
    %72 = vector.load %arg7[%c0_61, %c8_62, %c0_63] : memref<2x264x32xf32, #tpu.memory_space<vmem>>, vector<2x64x32xf32>
    tpu.vector_store %arg7[%c0_61, %c8_62, %c0_63], %71 {strides = array<i32>} : memref<2x264x32xf32, #tpu.memory_space<vmem>>, vector<2x64x32xf32>,
    %c0_64 = arith.constant 0 : index
    %c5_65 = arith.constant 5 : index
    %c0_66 = arith.constant 0 : index
    %73 = tpu.strided_load %arg7[%c0_64, %c5_65, %c0_66] {strides = array<i32: 1, 4, 1>} : memref<2x264x32xf32, #tpu.memory_space<vmem>>, vector<2x16x32xf32>
    %c0_67 = arith.constant 0 : index
    %c6_68 = arith.constant 6 : index
    %c0_69 = arith.constant 0 : index
    %74 = tpu.strided_load %arg7[%c0_67, %c6_68, %c0_69] {strides = array<i32: 1, 4, 1>} : memref<2x264x32xf32, #tpu.memory_space<vmem>>, vector<2x16x32xf32>
    %c0_70 = arith.constant 0 : index
    %c7_71 = arith.constant 7 : index
    %c0_72 = arith.constant 0 : index
    %75 = tpu.strided_load %arg7[%c0_70, %c7_71, %c0_72] {strides = array<i32: 1, 4, 1>} : memref<2x264x32xf32, #tpu.memory_space<vmem>>, vector<2x16x32xf32>
    %c0_73 = arith.constant 0 : index
    %c8_74 = arith.constant 8 : index
    %c0_75 = arith.constant 0 : index
    %76 = tpu.strided_load %arg7[%c0_73, %c8_74, %c0_75] {strides = array<i32: 1, 4, 1>} : memref<2x264x32xf32, #tpu.memory_space<vmem>>, vector<2x16x32xf32>
    %c0_76 = arith.constant 0 : index
    %c9_77 = arith.constant 9 : index
    %c0_78 = arith.constant 0 : index
    %77 = tpu.strided_load %arg7[%c0_76, %c9_77, %c0_78] {strides = array<i32: 1, 4, 1>} : memref<2x264x32xf32, #tpu.memory_space<vmem>>, vector<2x16x32xf32>
    %c0_79 = arith.constant 0 : index
    %c10_80 = arith.constant 10 : index
    %c0_81 = arith.constant 0 : index
    %78 = tpu.strided_load %arg7[%c0_79, %c10_80, %c0_81] {strides = array<i32: 1, 4, 1>} : memref<2x264x32xf32, #tpu.memory_space<vmem>>, vector<2x16x32xf32>
    %c0_82 = arith.constant 0 : index
    %c11_83 = arith.constant 11 : index
    %c0_84 = arith.constant 0 : index
    %79 = tpu.strided_load %arg7[%c0_82, %c11_83, %c0_84] {strides = array<i32: 1, 4, 1>} : memref<2x264x32xf32, #tpu.memory_space<vmem>>, vector<2x16x32xf32>
    %80 = tpu.concatenate %73, %74, %75, %76, %77, %78, %79 in 2 : vector<2x16x32xf32>, vector<2x16x32xf32>, vector<2x16x32xf32>, vector<2x16x32xf32>, vector<2x16x32xf32>, vector<2x16x32xf32>, vector<2x16x32xf32> -> vector<2x16x224xf32>
    %81 = vector.shape_cast %80 : vector<2x16x224xf32> to vector<32x224xf32>
    %82 = arith.truncf %81 : vector<32x224xf32> to vector<32x224xbf16>
    %cst_85 = arith.constant dense<0.000000e+00> : vector<32x32xf32>
    %83 = tpu.matmul %82, %26, %cst_85 {dimension_numbers = #tpu.dot_dimension_numbers<[1], [0], [0], [1], [0, 0, 1, 1], [], []>} : vector<32x224xbf16>, vector<224x32xbf16>, vector<32x32xf32> -> vector<32x32xf32>
    %84 = vector.broadcast %4 : vector<1x32xf32> to vector<32x32xf32>
    %85 = arith.addf %83, %84 : vector<32x32xf32>
    %cst_86 = arith.constant dense<0.000000e+00> : vector<32xf32>
    %86 = vector.multi_reduction <add>, %85, %cst_86 [0] : vector<32x32xf32> to vector<32xf32>
    %87 = vector.shape_cast %86 : vector<32xf32> to vector<1x32xf32>
    %cst_87 = arith.constant 3.125000e-02 : f32
    %88 = vector.broadcast %cst_87 : f32 to vector<1x32xf32>
    %89 = arith.mulf %87, %88 : vector<1x32xf32>
    %90 = arith.mulf %85, %85 : vector<32x32xf32>
    %cst_88 = arith.constant dense<0.000000e+00> : vector<32xf32>
    %91 = vector.multi_reduction <add>, %90, %cst_88 [0] : vector<32x32xf32> to vector<32xf32>
    %92 = vector.shape_cast %91 : vector<32xf32> to vector<1x32xf32>
    %cst_89 = arith.constant 3.125000e-02 : f32
    %93 = vector.broadcast %cst_89 : f32 to vector<1x32xf32>
    %94 = arith.mulf %92, %93 : vector<1x32xf32>
    %95 = arith.mulf %89, %89 : vector<1x32xf32>
    %96 = arith.subf %94, %95 : vector<1x32xf32>
    %cst_90 = arith.constant 0.000000e+00 : f32
    %97 = vector.broadcast %cst_90 : f32 to vector<1x32xf32>
    %98 = arith.maximumf %96, %97 : vector<1x32xf32>
    %cst_91 = arith.constant 9.99999974E-6 : f32
    %99 = vector.broadcast %cst_91 : f32 to vector<1x32xf32>
    %100 = arith.addf %98, %99 : vector<1x32xf32>
    %101 = math.rsqrt %100 : vector<1x32xf32>
    %102 = arith.mulf %5, %101 : vector<1x32xf32>
    %103 = arith.mulf %89, %102 : vector<1x32xf32>
    %104 = arith.subf %6, %103 : vector<1x32xf32>
    %105 = vector.broadcast %102 : vector<1x32xf32> to vector<32x32xf32>
    %106 = arith.mulf %85, %105 : vector<32x32xf32>
    %107 = vector.broadcast %104 : vector<1x32xf32> to vector<32x32xf32>
    %108 = arith.addf %106, %107 : vector<32x32xf32>
    %cst_92 = arith.constant 0.000000e+00 : f32
    %109 = vector.broadcast %cst_92 : f32 to vector<32x32xf32>
    %110 = arith.cmpf ogt, %108, %109 : vector<32x32xf32>
    %cst_93 = arith.constant 2.000000e-01 : f32
    %111 = vector.broadcast %cst_93 : f32 to vector<32x32xf32>
    %112 = arith.mulf %111, %108 : vector<32x32xf32>
    %113 = arith.select %110, %108, %112 : vector<32x32xi1>, vector<32x32xf32>
    %114 = vector.shape_cast %113 : vector<32x32xf32> to vector<2x16x32xf32>
    %c0_94 = arith.constant 0 : index
    %c8_95 = arith.constant 8 : index
    %c0_96 = arith.constant 0 : index
    %115 = vector.load %arg7[%c0_94, %c8_95, %c0_96] : memref<2x264x32xf32, #tpu.memory_space<vmem>>, vector<2x16x32xf32>
    tpu.vector_store %arg7[%c0_94, %c8_95, %c0_96], %114 {strides = array<i32>} : memref<2x264x32xf32, #tpu.memory_space<vmem>>, vector<2x16x32xf32>,
    %c0_97 = arith.constant 0 : index
    %c5_98 = arith.constant 5 : index
    %c0_99 = arith.constant 0 : index
    %116 = tpu.strided_load %arg7[%c0_97, %c5_98, %c0_99] {strides = array<i32: 1, 4, 1>} : memref<2x264x32xf32, #tpu.memory_space<vmem>>, vector<2x4x32xf32>
    %c0_100 = arith.constant 0 : index
    %c6_101 = arith.constant 6 : index
    %c0_102 = arith.constant 0 : index
    %117 = tpu.strided_load %arg7[%c0_100, %c6_101, %c0_102] {strides = array<i32: 1, 4, 1>} : memref<2x264x32xf32, #tpu.memory_space<vmem>>, vector<2x4x32xf32>
    %c0_103 = arith.constant 0 : index
    %c7_104 = arith.constant 7 : index
    %c0_105 = arith.constant 0 : index
    %118 = tpu.strided_load %arg7[%c0_103, %c7_104, %c0_105] {strides = array<i32: 1, 4, 1>} : memref<2x264x32xf32, #tpu.memory_space<vmem>>, vector<2x4x32xf32>
    %c0_106 = arith.constant 0 : index
    %c8_107 = arith.constant 8 : index
    %c0_108 = arith.constant 0 : index
    %119 = tpu.strided_load %arg7[%c0_106, %c8_107, %c0_108] {strides = array<i32: 1, 4, 1>} : memref<2x264x32xf32, #tpu.memory_space<vmem>>, vector<2x4x32xf32>
    %c0_109 = arith.constant 0 : index
    %c9_110 = arith.constant 9 : index
    %c0_111 = arith.constant 0 : index
    %120 = tpu.strided_load %arg7[%c0_109, %c9_110, %c0_111] {strides = array<i32: 1, 4, 1>} : memref<2x264x32xf32, #tpu.memory_space<vmem>>, vector<2x4x32xf32>
    %c0_112 = arith.constant 0 : index
    %c10_113 = arith.constant 10 : index
    %c0_114 = arith.constant 0 : index
    %121 = tpu.strided_load %arg7[%c0_112, %c10_113, %c0_114] {strides = array<i32: 1, 4, 1>} : memref<2x264x32xf32, #tpu.memory_space<vmem>>, vector<2x4x32xf32>
    %c0_115 = arith.constant 0 : index
    %c11_116 = arith.constant 11 : index
    %c0_117 = arith.constant 0 : index
    %122 = tpu.strided_load %arg7[%c0_115, %c11_116, %c0_117] {strides = array<i32: 1, 4, 1>} : memref<2x264x32xf32, #tpu.memory_space<vmem>>, vector<2x4x32xf32>
    %123 = tpu.concatenate %116, %117, %118, %119, %120, %121, %122 in 2 : vector<2x4x32xf32>, vector<2x4x32xf32>, vector<2x4x32xf32>, vector<2x4x32xf32>, vector<2x4x32xf32>, vector<2x4x32xf32>, vector<2x4x32xf32> -> vector<2x4x224xf32>
    %124 = vector.extract_strided_slice %123 {offsets = [0, 0, 0], sizes = [1, 4, 224], strides = [1, 1, 1]} : vector<2x4x224xf32> to vector<1x4x224xf32>
    %125 = vector.shape_cast %124 : vector<1x4x224xf32> to vector<4x224xf32>
    %126 = vector.extract_strided_slice %123 {offsets = [1, 0, 0], sizes = [1, 4, 224], strides = [1, 1, 1]} : vector<2x4x224xf32> to vector<1x4x224xf32>
    %127 = vector.shape_cast %126 : vector<1x4x224xf32> to vector<4x224xf32>
    %128 = tpu.concatenate %125, %127 in 0 : vector<4x224xf32>, vector<4x224xf32> -> vector<8x224xf32>
    %129 = arith.truncf %128 : vector<8x224xf32> to vector<8x224xbf16>
    %cst_118 = arith.constant dense<0.000000e+00> : vector<8x32xf32>
    %130 = tpu.matmul %129, %29, %cst_118 {dimension_numbers = #tpu.dot_dimension_numbers<[1], [0], [0], [1], [0, 0, 1, 1], [], []>} : vector<8x224xbf16>, vector<224x32xbf16>, vector<8x32xf32> -> vector<8x32xf32>
    %131 = vector.broadcast %7 : vector<1x32xf32> to vector<8x32xf32>
    %132 = arith.addf %130, %131 : vector<8x32xf32>
    %cst_119 = arith.constant dense<0.000000e+00> : vector<32xf32>
    %133 = vector.multi_reduction <add>, %132, %cst_119 [0] : vector<8x32xf32> to vector<32xf32>
    %134 = vector.shape_cast %133 : vector<32xf32> to vector<1x32xf32>
    %cst_120 = arith.constant 1.250000e-01 : f32
    %135 = vector.broadcast %cst_120 : f32 to vector<1x32xf32>
    %136 = arith.mulf %134, %135 : vector<1x32xf32>
    %137 = arith.mulf %132, %132 : vector<8x32xf32>
    %cst_121 = arith.constant dense<0.000000e+00> : vector<32xf32>
    %138 = vector.multi_reduction <add>, %137, %cst_121 [0] : vector<8x32xf32> to vector<32xf32>
    %139 = vector.shape_cast %138 : vector<32xf32> to vector<1x32xf32>
    %cst_122 = arith.constant 1.250000e-01 : f32
    %140 = vector.broadcast %cst_122 : f32 to vector<1x32xf32>
    %141 = arith.mulf %139, %140 : vector<1x32xf32>
    %142 = arith.mulf %136, %136 : vector<1x32xf32>
    %143 = arith.subf %141, %142 : vector<1x32xf32>
    %cst_123 = arith.constant 0.000000e+00 : f32
    %144 = vector.broadcast %cst_123 : f32 to vector<1x32xf32>
    %145 = arith.maximumf %143, %144 : vector<1x32xf32>
    %cst_124 = arith.constant 9.99999974E-6 : f32
    %146 = vector.broadcast %cst_124 : f32 to vector<1x32xf32>
    %147 = arith.addf %145, %146 : vector<1x32xf32>
    %148 = math.rsqrt %147 : vector<1x32xf32>
    %149 = arith.mulf %8, %148 : vector<1x32xf32>
    %150 = arith.mulf %136, %149 : vector<1x32xf32>
    %151 = arith.subf %9, %150 : vector<1x32xf32>
    %152 = vector.broadcast %149 : vector<1x32xf32> to vector<8x32xf32>
    %153 = arith.mulf %132, %152 : vector<8x32xf32>
    %154 = vector.broadcast %151 : vector<1x32xf32> to vector<8x32xf32>
    %155 = arith.addf %153, %154 : vector<8x32xf32>
    %cst_125 = arith.constant 0.000000e+00 : f32
    %156 = vector.broadcast %cst_125 : f32 to vector<8x32xf32>
    %157 = arith.cmpf ogt, %155, %156 : vector<8x32xf32>
    %cst_126 = arith.constant 2.000000e-01 : f32
    %158 = vector.broadcast %cst_126 : f32 to vector<8x32xf32>
    %159 = arith.mulf %158, %155 : vector<8x32xf32>
    %160 = arith.select %157, %155, %159 : vector<8x32xi1>, vector<8x32xf32>
    %161 = vector.extract_strided_slice %160 {offsets = [0, 0], sizes = [1, 32], strides = [1, 1]} : vector<8x32xf32> to vector<1x32xf32>
    %162 = vector.extract_strided_slice %160 {offsets = [1, 0], sizes = [1, 32], strides = [1, 1]} : vector<8x32xf32> to vector<1x32xf32>
    %163 = vector.extract_strided_slice %160 {offsets = [2, 0], sizes = [1, 32], strides = [1, 1]} : vector<8x32xf32> to vector<1x32xf32>
    %164 = vector.extract_strided_slice %160 {offsets = [3, 0], sizes = [1, 32], strides = [1, 1]} : vector<8x32xf32> to vector<1x32xf32>
    %165 = tpu.concatenate %161, %162, %163, %164 in 1 : vector<1x32xf32>, vector<1x32xf32>, vector<1x32xf32>, vector<1x32xf32> -> vector<1x128xf32>
    %166 = vector.extract_strided_slice %160 {offsets = [4, 0], sizes = [1, 32], strides = [1, 1]} : vector<8x32xf32> to vector<1x32xf32>
    %167 = vector.extract_strided_slice %160 {offsets = [5, 0], sizes = [1, 32], strides = [1, 1]} : vector<8x32xf32> to vector<1x32xf32>
    %168 = vector.extract_strided_slice %160 {offsets = [6, 0], sizes = [1, 32], strides = [1, 1]} : vector<8x32xf32> to vector<1x32xf32>
    %169 = vector.extract_strided_slice %160 {offsets = [7, 0], sizes = [1, 32], strides = [1, 1]} : vector<8x32xf32> to vector<1x32xf32>
    %170 = tpu.concatenate %166, %167, %168, %169 in 1 : vector<1x32xf32>, vector<1x32xf32>, vector<1x32xf32>, vector<1x32xf32> -> vector<1x128xf32>
    %171 = tpu.concatenate %165, %170 in 0 : vector<1x128xf32>, vector<1x128xf32> -> vector<2x128xf32>
    %c0_127 = arith.constant 0 : index
    %c0_128 = arith.constant 0 : index
    %172 = vector.load %arg4[%c0_127, %c0_128] : memref<128x1xf32, #tpu.memory_space<vmem>>, vector<128x1xf32>
    %cst_129 = arith.constant dense<0.000000e+00> : vector<2x1xf32>
    %173 = tpu.matmul %171, %172, %cst_129 {dimension_numbers = #tpu.dot_dimension_numbers<[1], [0], [0], [1], [0, 0, 1, 1], [], []>} : vector<2x128xf32>, vector<128x1xf32>, vector<2x1xf32> -> vector<2x1xf32>
    %c0_130 = arith.constant 0 : index
    %c0_131 = arith.constant 0 : index
    %174 = vector.load %arg5[%c0_130, %c0_131] : memref<1x1xf32, #tpu.memory_space<vmem>>, vector<1x1xf32>
    %175 = vector.broadcast %174 : vector<1x1xf32> to vector<2x1xf32>
    %176 = arith.addf %173, %175 : vector<2x1xf32>
    %c0_132 = arith.constant 0 : index
    %c0_133 = arith.constant 0 : index
    %177 = vector.load %arg6[%c0_132, %c0_133] : memref<2x1xf32, #tpu.memory_space<vmem>>, vector<2x1xf32>
    tpu.vector_store %arg6[%c0_132, %c0_133], %176 {strides = array<i32>} : memref<2x1xf32, #tpu.memory_space<vmem>>, vector<2x1xf32>,
    return
  }
}

</mosaic_0001>

<bundles_post_ra>
// kernel: tpu_custom_call.1
= control target key start
LH: loop header
LB: loop body
LE: loop exit
PB: predicated region body
PF: predicated region fallthrough
CT: control target
= control target key end

     0   :  { %vm99_vm0 = vcmask 146432   ;;  %vm268_vm1 = vcmask 1041408   ;;  %vm617_vm2 = vcmask 261120   ;;  %v2971_v60 = vmov 0.0   ;;  %s2973_s15 = smov 64   ;;  %s2974_s16 = smov 32   ;;  %s4157_s1 = inlined_call_operand.vmem [shape: f32[18,32], index: 1, kind: input, shape index: {}]   ;;  %s4158_s0 = inlined_call_operand.vmem [shape: f32[448,18], index: 0, kind: input, shape index: {}]   ;;  %s4159_s3 = inlined_call_operand.vmem [shape: f32[3,224,32], index: 3, kind: input, shape index: {}]   ;;  %s4160_s2 = inlined_call_operand.vmem [shape: f32[10,32], index: 2, kind: input, shape index: {}]   ;;  %s4161_s4 = inlined_call_operand.vmem [shape: f32[128,1], index: 4, kind: input, shape index: {}]   ;;  %s4162_s5 = inlined_call_operand.<no memory space> [shape: f32[1,1], index: 5, kind: input, shape index: {}]   ;;  %s4163_s6 = inlined_call_operand.vmem [shape: f32[2,1], index: 6, kind: output, shape index: {}]  }
   0x1   :  { %v92_v0 = vld [vmem:[%s4157_s1] sm:$0xff]  ;;  %v93_v1 = vld [vmem:[%s4157_s1 + $0x8] sm:$0xff]  ;;  %v94_v5 = vld [vmem:[%s4157_s1 + $0x10] sm:$0x3]  ;;  %618 = vst.msk [vmem:[#allocation2] sm:$0xff] %vm617_vm2, %v2971_v60  ;;  %v2972_v61 = vmov 0  }
   0x2   :  { %v2656_v2 = vpack.c.bf16 %v93_v1, %v92_v0  ;;  %v36_v3 = vld [vmem:[%s4158_s0] sm:$0xff]  ;;  %v37_v6 = vld [vmem:[%s4158_s0 + $0x8] sm:$0xff]  ;;  %v38_v8 = vld [vmem:[%s4158_s0 + $0x10] sm:$0xff]  ;;  %619 = vst.msk [vmem:[#allocation2 + $0x108] sm:$0xff] %vm617_vm2, %v2971_v60  ;;  %s2975_s21 = smov 96   ;;  %vm1372_vm3 = vcmask 523264  }
   0x3   :  { %v64_v4 = vld [vmem:[%s4158_s0 + $0xe0] sm:$0xff]  ;;  %2537 = vmatprep.mubr.msk.f32.mxu0 %vm99_vm0, %v36_v3  ;;  %v65_v7 = vld [vmem:[%s4158_s0 + $0xe8] sm:$0xff]  ;;  %v66_v9 = vld [vmem:[%s4158_s0 + $0xf0] sm:$0xff]  ;;  %620 = vst.msk [vmem:[#allocation2 + $0xe8] sm:$0xff] %vm617_vm2, %v2971_v60  ;;  %vm1389_vm4 = vcmask 785408  }
   0x4   :  { %2579 = vmatprep.mubr.msk.f32.mxu1 %vm99_vm0, %v64_v4  ;;  %2657 = vmatprep.subr.bf16.mxu0 %v2656_v2  ;;  %v39_v10 = vld [vmem:[%s4158_s0 + $0x18] sm:$0xff]  ;;  %v40_v12 = vld [vmem:[%s4158_s0 + $0x20] sm:$0xff]  ;;  %v41_v14 = vld [vmem:[%s4158_s0 + $0x28] sm:$0xff]  ;;  %621 = vst.msk [vmem:[#allocation2 + $0xf0] sm:$0xff] %vm617_vm2, %v2971_v60 }
   0x5   :  { %2684 = vmatprep.subr.bf16.mxu1 %v2656_v2  ;;  %2659 = vmatpush3.bf16.msra.mxu0 %v2656_v2  ;;  %v67_v11 = vld [vmem:[%s4158_s0 + $0xf8] sm:$0xff]  ;;  %v68_v13 = vld [vmem:[%s4158_s0 + $0x100] sm:$0xff]  ;;  %v69_v15 = vld [vmem:[%s4158_s0 + $0x108] sm:$0xff]  ;;  %622 = vst.msk [vmem:[#allocation2 + $0xf8] sm:$0xff] %vm617_vm2, %v2971_v60 }
   0x6   :  { %2686 = vmatpush3.bf16.msra.mxu1 %v2656_v2  ;;  %2535 = vmatprep.subr.msk.mxu0 %vm268_vm1, %v94_v5  ;;  %v42_v16 = vld [vmem:[%s4158_s0 + $0x30] sm:$0xff]  ;;  %v43_v18 = vld [vmem:[%s4158_s0 + $0x38] sm:$0xff]  ;;  %v44_v20 = vld [vmem:[%s4158_s0 + $0x40] sm:$0xff]  ;;  %623 = vst.msk [vmem:[#allocation2 + $0x100] sm:$0xff] %vm617_vm2, %v2971_v60 }
   0x7   :  { %2685 = vmatprep.subr.msk.mxu1 %vm268_vm1, %v94_v5  ;;  %v70_v17 = vld [vmem:[%s4158_s0 + $0x110] sm:$0xff]  ;;  %v71_v19 = vld [vmem:[%s4158_s0 + $0x118] sm:$0xff]  ;;  %v72_v21 = vld [vmem:[%s4158_s0 + $0x120] sm:$0xff]  ;;  %624 = vst.msk [vmem:[#allocation2 + $0x1f0] sm:$0xff] %vm617_vm2, %v2971_v60 }
   0x8   :  { %v45_v22 = vld [vmem:[%s4158_s0 + $0x48] sm:$0xff]  ;;  %v46_v24 = vld [vmem:[%s4158_s0 + $0x50] sm:$0xff]  ;;  %v47_v26 = vld [vmem:[%s4158_s0 + $0x58] sm:$0xff]  ;;  %625 = vst.msk [vmem:[#allocation2 + $0x1f8] sm:$0xff] %vm617_vm2, %v2971_v60 }
   0x9   :  { %2536 = vmatpush3.msk.msra.mxu0 %vm268_vm1, %v94_v5  ;;  %v73_v23 = vld [vmem:[%s4158_s0 + $0x128] sm:$0xff]  ;;  %v74_v25 = vld [vmem:[%s4158_s0 + $0x130] sm:$0xff]  ;;  %v75_v27 = vld [vmem:[%s4158_s0 + $0x138] sm:$0xff]  ;;  %626 = vst.msk [vmem:[#allocation2 + $0x200] sm:$0xff] %vm617_vm2, %v2971_v60 }
   0xa   :  { %2687 = vmatpush3.msk.msra.mxu1 %vm268_vm1, %v94_v5  ;;  %2538 = vmatmul.mubr.msk.f32.vlgmr.msra.gmra.mrb[0].mxu0 %vm99_vm0, %v37_v6  ;;  %v48_v28 = vld [vmem:[%s4158_s0 + $0x60] sm:$0xff]  ;;  %v49_v30 = vld [vmem:[%s4158_s0 + $0x68] sm:$0xff]  ;;  %v50_v32 = vld [vmem:[%s4158_s0 + $0x70] sm:$0xff]  ;;  %627 = vst.msk [vmem:[#allocation2 + $0x208] sm:$0xff] %vm617_vm2, %v2971_v60 }
   0xb   :  { %2580 = vmatmul.mubr.msk.f32.vlgmr.msra.gmra.mrb[0].mxu1 %vm99_vm0, %v65_v7  ;;  %2540 = vmatprep.mubr.msk.f32.mxu0 %vm99_vm0, %v38_v8  ;;  %v76_v29 = vld [vmem:[%s4158_s0 + $0x140] sm:$0xff]  ;;  %v77_v31 = vld [vmem:[%s4158_s0 + $0x148] sm:$0xff]  ;;  %v78_v33 = vld [vmem:[%s4158_s0 + $0x150] sm:$0xff] }
   0xc   :  { %2582 = vmatprep.mubr.msk.f32.mxu1 %vm99_vm0, %v66_v9  ;;  %v51_v34 = vld [vmem:[%s4158_s0 + $0x78] sm:$0xff]  ;;  %v52_v36 = vld [vmem:[%s4158_s0 + $0x80] sm:$0xff]  ;;  %v53_v38 = vld [vmem:[%s4158_s0 + $0x88] sm:$0xff]  ;;  %1482 = vmatprep.subr.bf16.mxu1 %v2972_v61 }
   0xd   :  { %v79_v35 = vld [vmem:[%s4158_s0 + $0x158] sm:$0xff]  ;;  %v80_v37 = vld [vmem:[%s4158_s0 + $0x160] sm:$0xff]  ;;  %v81_v39 = vld [vmem:[%s4158_s0 + $0x168] sm:$0xff]  ;;  %1925 = vmatprep.subr.bf16.mxu0 %v2972_v61 }
   0xe   :  { %2541 = vmatmul.mubr.msk.f32.gmra.mrb[2].mxu0 %vm99_vm0, %v39_v10  ;;  %v54_v40 = vld [vmem:[%s4158_s0 + $0x90] sm:$0xff]  ;;  %v55_v42 = vld [vmem:[%s4158_s0 + $0x98] sm:$0xff]  ;;  %v56_v44 = vld [vmem:[%s4158_s0 + $0xa0] sm:$0xff] }
   0xf   :  { %2583 = vmatmul.mubr.msk.f32.gmra.mrb[2].mxu1 %vm99_vm0, %v67_v11  ;;  %2543 = vmatprep.mubr.msk.f32.mxu0 %vm99_vm0, %v40_v12  ;;  %v82_v41 = vld [vmem:[%s4158_s0 + $0x170] sm:$0xff]  ;;  %v83_v43 = vld [vmem:[%s4158_s0 + $0x178] sm:$0xff]  ;;  %v84_v45 = vld [vmem:[%s4158_s0 + $0x180] sm:$0xff] }
  0x10   :  { %2585 = vmatprep.mubr.msk.f32.mxu1 %vm99_vm0, %v68_v13  ;;  %v57_v46 = vld [vmem:[%s4158_s0 + $0xa8] sm:$0xff]  ;;  %v58_v48 = vld [vmem:[%s4158_s0 + $0xb0] sm:$0xff]  ;;  %v59_v50 = vld [vmem:[%s4158_s0 + $0xb8] sm:$0xff] }
  0x11   :  { %v85_v47 = vld [vmem:[%s4158_s0 + $0x188] sm:$0xff]  ;;  %v86_v49 = vld [vmem:[%s4158_s0 + $0x190] sm:$0xff]  ;;  %v87_v51 = vld [vmem:[%s4158_s0 + $0x198] sm:$0xff] }
  0x12   :  { %2544 = vmatmul.mubr.msk.f32.gmra.mrb[4].mxu0 %vm99_vm0, %v41_v14  ;;  %v60_v52 = vld [vmem:[%s4158_s0 + $0xc0] sm:$0xff]  ;;  %v61_v54 = vld [vmem:[%s4158_s0 + $0xc8] sm:$0xff]  ;;  %v62_v56 = vld [vmem:[%s4158_s0 + $0xd0] sm:$0xff] }
  0x13   :  { %2586 = vmatmul.mubr.msk.f32.gmra.mrb[4].mxu1 %vm99_vm0, %v69_v15  ;;  %2546 = vmatprep.mubr.msk.f32.mxu0 %vm99_vm0, %v42_v16  ;;  %v88_v53 = vld [vmem:[%s4158_s0 + $0x1a0] sm:$0xff]  ;;  %v89_v55 = vld [vmem:[%s4158_s0 + $0x1a8] sm:$0xff]  ;;  %v90_v57 = vld [vmem:[%s4158_s0 + $0x1b0] sm:$0xff] }
  0x14   :  { %2588 = vmatprep.mubr.msk.f32.mxu1 %vm99_vm0, %v70_v17  ;;  %v63_v58 = vld [vmem:[%s4158_s0 + $0xd8] sm:$0xff]  ;;  %v684_v62 = vld [vmem:[%s4159_s3] sm:$0xff]  ;;  %v685_v63 = vld [vmem:[%s4159_s3 + $0x8] sm:$0xff] }
  0x15   :  { %v91_v59 = vld [vmem:[%s4158_s0 + $0x1b8] sm:$0xff]  ;;  %v712_v0 = vpack.c.bf16 %v685_v63, %v684_v62  ;;  %v686_v1 = vld [vmem:[%s4159_s3 + $0x10] sm:$0xff]  ;;  %v688_v4 = vld [vmem:[%s4159_s3 + $0x20] sm:$0xff] }
  0x16   :  { %2547 = vmatmul.mubr.msk.f32.gmra.mrb[6].mxu0 %vm99_vm0, %v43_v18  ;;  %v687_v2 = vld [vmem:[%s4159_s3 + $0x18] sm:$0xff]  ;;  %v689_v5 = vld [vmem:[%s4159_s3 + $0x28] sm:$0xff]  ;;  %v690_v7 = vld [vmem:[%s4159_s3 + $0x30] sm:$0xff] }
  0x17   :  { %2589 = vmatmul.mubr.msk.f32.gmra.mrb[6].mxu1 %vm99_vm0, %v71_v19  ;;  %2549 = vmatprep.mubr.msk.f32.mxu0 %vm99_vm0, %v44_v20  ;;  %v713_v3 = vpack.c.bf16 %v687_v2, %v686_v1  ;;  %v714_v6 = vpack.c.bf16 %v689_v5, %v688_v4  ;;  %v691_v8 = vld [vmem:[%s4159_s3 + $0x38] sm:$0xff]  ;;  %v692_v10 = vld [vmem:[%s4159_s3 + $0x40] sm:$0xff]  ;;  %v693_v11 = vld [vmem:[%s4159_s3 + $0x48] sm:$0xff] }
  0x18   :  { %2591 = vmatprep.mubr.msk.f32.mxu1 %vm99_vm0, %v72_v21  ;;  %1483 = vmatpush1.bf16.msra.mxu1 %v712_v0  ;;  %v715_v9 = vpack.c.bf16 %v691_v8, %v690_v7  ;;  %v716_v12 = vpack.c.bf16 %v693_v11, %v692_v10  ;;  %v694_v13 = vld [vmem:[%s4159_s3 + $0x50] sm:$0xff]  ;;  %v695_v14 = vld [vmem:[%s4159_s3 + $0x58] sm:$0xff]  ;;  %v696_v16 = vld [vmem:[%s4159_s3 + $0x60] sm:$0xff] }
  0x19   :  { %1484 = vmatprep.subr.bf16.mxu1 %v2972_v61  ;;  %v717_v15 = vpack.c.bf16 %v695_v14, %v694_v13  ;;  %v697_v17 = vld [vmem:[%s4159_s3 + $0x68] sm:$0xff]  ;;  %v698_v19 = vld [vmem:[%s4159_s3 + $0x70] sm:$0xff]  ;;  %v699_v20 = vld [vmem:[%s4159_s3 + $0x78] sm:$0xff] }
  0x1a   :  { %2550 = vmatmul.mubr.msk.f32.gmra.mrb[8].mxu0 %vm99_vm0, %v45_v22  ;;  %v718_v18 = vpack.c.bf16 %v697_v17, %v696_v16  ;;  %v3325_v21 = vld [vmem:[%s4160_s2] ss:$0 sm:$0xff]  ;;  %v719_v22 = vpack.c.bf16 %v699_v20, %v698_v19  ;;  %v706_v10 = vld [vmem:[%s4159_s3 + $0xb0] sm:$0xff]  ;;  %v707_v11 = vld [vmem:[%s4159_s3 + $0xb8] sm:$0xff] }
  0x1b   :  { %2592 = vmatmul.mubr.msk.f32.gmra.mrb[8].mxu1 %vm99_vm0, %v73_v23  ;;  %2552 = vmatprep.mubr.msk.f32.mxu0 %vm99_vm0, %v46_v24  ;;  %v700_v23 = vld [vmem:[%s4159_s3 + $0x80] sm:$0xff]  ;;  %v701_v24 = vld [vmem:[%s4159_s3 + $0x88] sm:$0xff]  ;;  %v723_v14 = vpack.c.bf16 %v707_v11, %v706_v10 }
  0x1c   :  { %2594 = vmatprep.mubr.msk.f32.mxu1 %vm99_vm0, %v74_v25  ;;  %1485 = vmatpush1.bf16.msra.mxu1 %v713_v3  ;;  %v709_v16 = vld [vmem:[%s4159_s3 + $0xc8] sm:$0xff] }
  0x1d   :  { %1486 = vmatprep.subr.bf16.mxu1 %v2972_v61 }
  0x1e   :  { %2553 = vmatmul.mubr.msk.f32.gmra.mrb[10].mxu0 %vm99_vm0, %v47_v26 }
  0x1f   :  { %2595 = vmatmul.mubr.msk.f32.gmra.mrb[10].mxu1 %vm99_vm0, %v75_v27  ;;  %2555 = vmatprep.mubr.msk.f32.mxu0 %vm99_vm0, %v48_v28 }
  0x20   :  { %2597 = vmatprep.mubr.msk.f32.mxu1 %vm99_vm0, %v76_v29  ;;  %1487 = vmatpush1.bf16.msra.mxu1 %v714_v6 }
  0x21   :  { %1488 = vmatprep.subr.bf16.mxu1 %v2972_v61 }
  0x22   :  { %2556 = vmatmul.mubr.msk.f32.gmra.mrb[12].mxu0 %vm99_vm0, %v49_v30 }
  0x23   :  { %2598 = vmatmul.mubr.msk.f32.gmra.mrb[12].mxu1 %vm99_vm0, %v77_v31  ;;  %2558 = vmatprep.mubr.msk.f32.mxu0 %vm99_vm0, %v50_v32 }
  0x24   :  { %2600 = vmatprep.mubr.msk.f32.mxu1 %vm99_vm0, %v78_v33  ;;  %1489 = vmatpush1.bf16.msra.mxu1 %v715_v9  ;;  %v720_v33 = vpack.c.bf16 %v701_v24, %v700_v23 }
  0x25   :  { %1490 = vmatprep.subr.bf16.mxu1 %v2972_v61 }
  0x26   :  { %2559 = vmatmul.mubr.msk.f32.gmra.mrb[14].mxu0 %vm99_vm0, %v51_v34  ;;  %v702_v34 = vld [vmem:[%s4159_s3 + $0x90] sm:$0xff] }
  0x27   :  { %2601 = vmatmul.mubr.msk.f32.gmra.mrb[14].mxu1 %vm99_vm0, %v79_v35  ;;  %2561 = vmatprep.mubr.msk.f32.mxu0 %vm99_vm0, %v52_v36  ;;  %v703_v35 = vld [vmem:[%s4159_s3 + $0x98] sm:$0xff] }
  0x28   :  { %2603 = vmatprep.mubr.msk.f32.mxu1 %vm99_vm0, %v80_v37  ;;  %1491 = vmatpush1.bf16.msra.mxu1 %v716_v12 }
  0x29   :  { %1492 = vmatprep.subr.bf16.mxu1 %v2972_v61 }
  0x2a   :  { %2562 = vmatmul.mubr.msk.f32.gmra.mrb[16].mxu0 %vm99_vm0, %v53_v38 }
  0x2b   :  { %2604 = vmatmul.mubr.msk.f32.gmra.mrb[16].mxu1 %vm99_vm0, %v81_v39  ;;  %2564 = vmatprep.mubr.msk.f32.mxu0 %vm99_vm0, %v54_v40 }
  0x2c   :  { %2606 = vmatprep.mubr.msk.f32.mxu1 %vm99_vm0, %v82_v41  ;;  %1493 = vmatpush1.bf16.msra.mxu1 %v717_v15  ;;  %v708_v15 = vld [vmem:[%s4159_s3 + $0xc0] sm:$0xff] }
  0x2d   :  { %1494 = vmatprep.subr.bf16.mxu1 %v2972_v61 }
  0x2e   :  { %2565 = vmatmul.mubr.msk.f32.gmra.mrb[18].mxu0 %vm99_vm0, %v55_v42 }
  0x2f   :  { %2607 = vmatmul.mubr.msk.f32.gmra.mrb[18].mxu1 %vm99_vm0, %v83_v43  ;;  %2567 = vmatprep.mubr.msk.f32.mxu0 %vm99_vm0, %v56_v44  ;;  %v721_v44 = vpack.c.bf16 %v703_v35, %v702_v34 }
  0x30   :  { %2609 = vmatprep.mubr.msk.f32.mxu1 %vm99_vm0, %v84_v45  ;;  %1495 = vmatpush1.bf16.msra.mxu1 %v718_v18  ;;  %v704_v45 = vld [vmem:[%s4159_s3 + $0xa0] sm:$0xff] }
  0x31   :  { %1496 = vmatprep.subr.bf16.mxu1 %v2972_v61 }
  0x32   :  { %2568 = vmatmul.mubr.msk.f32.gmra.mrb[20].mxu0 %vm99_vm0, %v57_v46  ;;  %v705_v46 = vld [vmem:[%s4159_s3 + $0xa8] sm:$0xff] }
  0x33   :  { %2610 = vmatmul.mubr.msk.f32.gmra.mrb[20].mxu1 %vm99_vm0, %v85_v47  ;;  %2570 = vmatprep.mubr.msk.f32.mxu0 %vm99_vm0, %v58_v48 }
  0x34   :  { %2612 = vmatprep.mubr.msk.f32.mxu1 %vm99_vm0, %v86_v49  ;;  %1497 = vmatpush1.bf16.msra.mxu1 %v719_v22 }
  0x35   :  { %1498 = vmatprep.subr.bf16.mxu1 %v2972_v61 }
  0x36   :  { %2571 = vmatmul.mubr.msk.f32.gmra.mrb[22].mxu0 %vm99_vm0, %v59_v50 }
  0x37   :  { %2613 = vmatmul.mubr.msk.f32.gmra.mrb[22].mxu1 %vm99_vm0, %v87_v51  ;;  %2573 = vmatprep.mubr.msk.f32.mxu0 %vm99_vm0, %v60_v52 }
  0x38   :  { %2615 = vmatprep.mubr.msk.f32.mxu1 %vm99_vm0, %v88_v53  ;;  %1499 = vmatpush1.bf16.msra.mxu1 %v720_v33 }
  0x39   :  { %1500 = vmatprep.subr.bf16.mxu1 %v2972_v61 }
  0x3a   :  { %2574 = vmatmul.mubr.msk.f32.gmra.mrb[24].mxu0 %vm99_vm0, %v61_v54 }
  0x3b   :  { %2616 = vmatmul.mubr.msk.f32.gmra.mrb[24].mxu1 %vm99_vm0, %v89_v55  ;;  %2576 = vmatprep.mubr.msk.f32.mxu0 %vm99_vm0, %v62_v56  ;;  %v722_v55 = vpack.c.bf16 %v705_v46, %v704_v45 }
  0x3c   :  { %2618 = vmatprep.mubr.msk.f32.mxu1 %vm99_vm0, %v90_v57  ;;  %1501 = vmatpush1.bf16.msra.mxu1 %v721_v44 }
  0x3d   :  { %1502 = vmatprep.subr.bf16.mxu1 %v2972_v61 }
  0x3e   :  { %2577 = vmatmul.mubr.msk.f32.gmra.mrb[26].mxu0 %vm99_vm0, %v63_v58 }
  0x3f   :  { %2619 = vmatmul.mubr.msk.f32.gmra.mrb[26].mxu1 %vm99_vm0, %v91_v59 }
  0x40   :  { %1503 = vmatpush1.bf16.msra.mxu1 %v722_v55 }
  0x41   :  { %1504 = vmatprep.subr.bf16.mxu1 %v2972_v61 }
  0x44   :  { %1505 = vmatpush1.bf16.msra.mxu1 %v723_v14 }
  0x45   :  { %1506 = vmatprep.subr.bf16.mxu1 %v2972_v61 }
  0xdd   :  { %v2539_v25 = vpop.f32.mrb[0].mxu0 }
  0xde   :  { %v2581_v26 = vpop.f32.mrb[0].mxu1  ;;  %v344_v27 = vadd.f32 %v2539_v25, %v3325_v21  ;;  %v338_v28 = vpop.f32.mrb[1].mxu0 }
  0xdf   :  { %v484_v29 = vadd.f32 %v2581_v26, %v3325_v21  ;;  %v478_v30 = vpop.f32.mrb[1].mxu1  ;;  %v339_v31 = vadd.f32 %v3325_v21, %v338_v28  ;;  %v724_v28 = vpack.c.bf16 %v709_v16, %v708_v15 }
  0xe0   :  { %v479_v32 = vadd.f32 %v3325_v21, %v478_v30  ;;  %629 = vst.msk [vmem:[#allocation2 + $0x10] sm:$0xff] %vm617_vm2, %v344_v27 }
  0xe1   :  { %657 = vst.msk [vmem:[#allocation2 + $0x118] sm:$0xff] %vm617_vm2, %v484_v29  ;;  %628 = vst.msk [vmem:[#allocation2 + $0x8] sm:$0xff] %vm617_vm2, %v339_v31  ;;  %v2542_v36 = vpop.f32.mrb[2].mxu0  ;;  %1507 = vmatpush1.bf16.msra.mxu1 %v724_v28 }
  0xe2   :  { %656 = vst.msk [vmem:[#allocation2 + $0x110] sm:$0xff] %vm617_vm2, %v479_v32  ;;  %v2584_v37 = vpop.f32.mrb[2].mxu1  ;;  %v354_v38 = vadd.f32 %v2542_v36, %v3325_v21  ;;  %v348_v39 = vpop.f32.mrb[3].mxu0  ;;  %1508 = vmatprep.subr.bf16.mxu1 %v2972_v61 }
  0xe3   :  { %v494_v40 = vadd.f32 %v2584_v37, %v3325_v21  ;;  %v488_v41 = vpop.f32.mrb[3].mxu1  ;;  %v349_v42 = vadd.f32 %v3325_v21, %v348_v39 }
  0xe4   :  { %v489_v43 = vadd.f32 %v3325_v21, %v488_v41  ;;  %631 = vst.msk [vmem:[#allocation2 + $0x20] sm:$0xff] %vm617_vm2, %v354_v38 }
  0xe5   :  { %659 = vst.msk [vmem:[#allocation2 + $0x128] sm:$0xff] %vm617_vm2, %v494_v40  ;;  %630 = vst.msk [vmem:[#allocation2 + $0x18] sm:$0xff] %vm617_vm2, %v349_v42  ;;  %v2545_v47 = vpop.f32.mrb[4].mxu0 }
  0xe6   :  { %658 = vst.msk [vmem:[#allocation2 + $0x120] sm:$0xff] %vm617_vm2, %v489_v43  ;;  %v2587_v48 = vpop.f32.mrb[4].mxu1  ;;  %v364_v49 = vadd.f32 %v2545_v47, %v3325_v21  ;;  %v358_v50 = vpop.f32.mrb[5].mxu0 }
  0xe7   :  { %v504_v51 = vadd.f32 %v2587_v48, %v3325_v21  ;;  %v498_v52 = vpop.f32.mrb[5].mxu1  ;;  %v359_v53 = vadd.f32 %v3325_v21, %v358_v50  ;;  %v710_v48 = vld [vmem:[%s4159_s3 + $0xd0] sm:$0xff] }
  0xe8   :  { %v499_v54 = vadd.f32 %v3325_v21, %v498_v52  ;;  %633 = vst.msk [vmem:[#allocation2 + $0x30] sm:$0xff] %vm617_vm2, %v364_v49  ;;  %v711_v49 = vld [vmem:[%s4159_s3 + $0xd8] sm:$0xff] }
  0xe9   :  { %661 = vst.msk [vmem:[#allocation2 + $0x138] sm:$0xff] %vm617_vm2, %v504_v51  ;;  %632 = vst.msk [vmem:[#allocation2 + $0x28] sm:$0xff] %vm617_vm2, %v359_v53  ;;  %v2548_v56 = vpop.f32.mrb[6].mxu0 }
  0xea   :  { %660 = vst.msk [vmem:[#allocation2 + $0x130] sm:$0xff] %vm617_vm2, %v499_v54  ;;  %v2590_v57 = vpop.f32.mrb[6].mxu1  ;;  %v374_v58 = vadd.f32 %v2548_v56, %v3325_v21  ;;  %v368_v62 = vpop.f32.mrb[7].mxu0  ;;  %v725_v56 = vpack.c.bf16 %v711_v49, %v710_v48 }
  0xeb   :  { %v514_v59 = vadd.f32 %v2590_v57, %v3325_v21  ;;  %v508_v63 = vpop.f32.mrb[7].mxu1  ;;  %v369_v0 = vadd.f32 %v3325_v21, %v368_v62 }
  0xec   :  { %v509_v1 = vadd.f32 %v3325_v21, %v508_v63  ;;  %635 = vst.msk [vmem:[#allocation2 + $0x40] sm:$0xff] %vm617_vm2, %v374_v58  ;;  %v877_v24 = vld [vmem:[#allocation2 + $0x7] ss:$4 sm:$0xff]  ;;  %v845_v26 = vld [vmem:[#allocation2 + $0x6] ss:$4 sm:$0xff]  ;;  %1509 = vmatpush1.bf16.msra.mxu1 %v725_v56 }
  0xed   :  { %663 = vst.msk [vmem:[#allocation2 + $0x148] sm:$0xff] %vm617_vm2, %v514_v59  ;;  %634 = vst.msk [vmem:[#allocation2 + $0x38] sm:$0xff] %vm617_vm2, %v369_v0  ;;  %v2551_v2 = vpop.f32.mrb[8].mxu0  ;;  %v1005_v41 = vld [vmem:[#allocation2 + $0xb] ss:$4 sm:$0xff]  ;;  %2128 = vmatprep.subr.bf16.mxu1 %v2972_v61 }
  0xee   :  { %662 = vst.msk [vmem:[#allocation2 + $0x140] sm:$0xff] %vm617_vm2, %v509_v1  ;;  %v2593_v3 = vpop.f32.mrb[8].mxu1  ;;  %v384_v4 = vadd.f32 %v2551_v2, %v3325_v21  ;;  %v378_v5 = vpop.f32.mrb[9].mxu0  ;;  %v973_v42 = vld [vmem:[#allocation2 + $0xa] ss:$4 sm:$0xff] }
  0xef   :  { %v524_v6 = vadd.f32 %v2593_v3, %v3325_v21  ;;  %v518_v7 = vpop.f32.mrb[9].mxu1  ;;  %v379_v8 = vadd.f32 %v3325_v21, %v378_v5  ;;  %v989_v47 = vld [vmem:[#allocation2 + $0x112] ss:$4 sm:$0xff]  ;;  %v909_v59 = vld [vmem:[#allocation2 + $0x8] ss:$4 sm:$0xff] }
  0xf0   :  { %v519_v9 = vadd.f32 %v3325_v21, %v518_v7  ;;  %637 = vst.msk [vmem:[#allocation2 + $0x50] sm:$0xff] %vm617_vm2, %v384_v4  ;;  %v1021_v1 = vld [vmem:[#allocation2 + $0x113] ss:$4 sm:$0xff]  ;;  %v861_v2 = vld [vmem:[#allocation2 + $0x10e] ss:$4 sm:$0xff] }
  0xf1   :  { %665 = vst.msk [vmem:[#allocation2 + $0x158] sm:$0xff] %vm617_vm2, %v524_v6  ;;  %636 = vst.msk [vmem:[#allocation2 + $0x48] sm:$0xff] %vm617_vm2, %v379_v8  ;;  %v2554_v12 = vpop.f32.mrb[10].mxu0 }
  0xf2   :  { %664 = vst.msk [vmem:[#allocation2 + $0x150] sm:$0xff] %vm617_vm2, %v519_v9  ;;  %v2596_v13 = vpop.f32.mrb[10].mxu1  ;;  %v394_v17 = vadd.f32 %v2554_v12, %v3325_v21  ;;  %v388_v18 = vpop.f32.mrb[11].mxu0 }
  0xf3   :  { %v534_v19 = vadd.f32 %v2596_v13, %v3325_v21  ;;  %v528_v20 = vpop.f32.mrb[11].mxu1  ;;  %v389_v22 = vadd.f32 %v3325_v21, %v388_v18  ;;  %v893_v18 = vld [vmem:[#allocation2 + $0x10f] ss:$4 sm:$0xff] }
  0xf4   :  { %v529_v23 = vadd.f32 %v3325_v21, %v528_v20  ;;  %639 = vst.msk [vmem:[#allocation2 + $0x60] sm:$0xff] %vm617_vm2, %v394_v17  ;;  %v879_v25 = vld [vmem:[#allocation2 + $0x27] ss:$4 sm:$0xff]  ;;  %v847_v27 = vld [vmem:[#allocation2 + $0x26] ss:$4 sm:$0xff] }
  0xf5   :  { %667 = vst.msk [vmem:[#allocation2 + $0x168] sm:$0xff] %vm617_vm2, %v534_v19  ;;  %638 = vst.msk [vmem:[#allocation2 + $0x58] sm:$0xff] %vm617_vm2, %v389_v22  ;;  %v2557_v29 = vpop.f32.mrb[12].mxu0  ;;  %v2705_v31 = vpack.i.bf16 %v879_v25, %v877_v24  ;;  %v2695_v32 = vpack.i.bf16 %v847_v27, %v845_v26  ;;  %v1007_v37 = vld [vmem:[#allocation2 + $0x2b] ss:$4 sm:$0xff] }
  0xf6   :  { %666 = vst.msk [vmem:[#allocation2 + $0x160] sm:$0xff] %vm617_vm2, %v529_v23  ;;  %v2599_v30 = vpop.f32.mrb[12].mxu1  ;;  %v404_v33 = vadd.f32 %v2557_v29, %v3325_v21  ;;  %v398_v34 = vpop.f32.mrb[13].mxu0  ;;  %v975_v38 = vld [vmem:[#allocation2 + $0x2a] ss:$4 sm:$0xff]  ;;  %v2710_v45 = vpack.i.bf16 %v1007_v37, %v1005_v41 }
  0xf7   :  { %v544_v35 = vadd.f32 %v2599_v30, %v3325_v21  ;;  %v538_v36 = vpop.f32.mrb[13].mxu1  ;;  %v399_v39 = vadd.f32 %v3325_v21, %v398_v34  ;;  %2706 = vrot.lane.b32.xlu1 %v2705_v31, %s2973_s15  ;;  %2696 = vrot.lane.b32.xlu0 %v2695_v32, %s2974_s16  ;;  %v2700_v46 = vpack.i.bf16 %v975_v38, %v973_v42  ;;  %v991_v54 = vld [vmem:[#allocation2 + $0x132] ss:$4 sm:$0xff]  ;;  %v911_v55 = vld [vmem:[#allocation2 + $0x28] ss:$4 sm:$0xff] }
  0xf8   :  { %v539_v40 = vadd.f32 %v3325_v21, %v538_v36  ;;  %641 = vst.msk [vmem:[#allocation2 + $0x70] sm:$0xff] %vm617_vm2, %v404_v33  ;;  %v2725_v63 = vpack.i.bf16 %v991_v54, %v989_v47  ;;  %v2715_v0 = vpack.i.bf16 %v911_v55, %v909_v59  ;;  %v1023_v6 = vld [vmem:[#allocation2 + $0x133] ss:$4 sm:$0xff]  ;;  %v863_v7 = vld [vmem:[#allocation2 + $0x12e] ss:$4 sm:$0xff] }
  0xf9   :  { %669 = vst.msk [vmem:[#allocation2 + $0x178] sm:$0xff] %vm617_vm2, %v544_v35  ;;  %640 = vst.msk [vmem:[#allocation2 + $0x68] sm:$0xff] %vm617_vm2, %v399_v39  ;;  %v2560_v43 = vpop.f32.mrb[14].mxu0  ;;  %v2735_v13 = vpack.i.bf16 %v1023_v6, %v1021_v1  ;;  %v2720_v14 = vpack.i.bf16 %v863_v7, %v861_v2  ;;  %v895_v19 = vld [vmem:[#allocation2 + $0x12f] ss:$4 sm:$0xff] }
  0xfa   :  { %668 = vst.msk [vmem:[#allocation2 + $0x170] sm:$0xff] %vm617_vm2, %v539_v40  ;;  %v2602_v44 = vpop.f32.mrb[14].mxu1  ;;  %v414_v50 = vadd.f32 %v2560_v43, %v3325_v21  ;;  %v408_v52 = vpop.f32.mrb[15].mxu0  ;;  %v2730_v29 = vpack.i.bf16 %v895_v19, %v893_v18 }
  0xfb   :  { %v554_v51 = vadd.f32 %v2602_v44, %v3325_v21  ;;  %v548_v53 = vpop.f32.mrb[15].mxu1  ;;  %v409_v57 = vadd.f32 %v3325_v21, %v408_v52  ;;  %2711 = vrot.lane.b32.xlu1 %v2710_v45, %s2973_s15  ;;  %2701 = vrot.lane.b32.xlu0 %v2700_v46, %s2974_s16 }
  0xfc   :  { %v549_v58 = vadd.f32 %v3325_v21, %v548_v53  ;;  %643 = vst.msk [vmem:[#allocation2 + $0x80] sm:$0xff] %vm617_vm2, %v414_v50  ;;  %v849_v25 = vld [vmem:[#allocation2 + $0x46] ss:$4 sm:$0xff]  ;;  %v881_v39 = vld [vmem:[#allocation2 + $0x47] ss:$4 sm:$0xff] }
  0xfd   :  { %671 = vst.msk [vmem:[#allocation2 + $0x188] sm:$0xff] %vm617_vm2, %v554_v51  ;;  %642 = vst.msk [vmem:[#allocation2 + $0x78] sm:$0xff] %vm617_vm2, %v409_v57  ;;  %v2563_v62 = vpop.f32.mrb[16].mxu0  ;;  %v977_v40 = vld [vmem:[#allocation2 + $0x4a] ss:$4 sm:$0xff] }
  0xfe   :  { %670 = vst.msk [vmem:[#allocation2 + $0x180] sm:$0xff] %vm617_vm2, %v549_v58  ;;  %v2605_v3 = vpop.f32.mrb[16].mxu1  ;;  %v424_v4 = vadd.f32 %v2563_v62, %v3325_v21  ;;  %v418_v5 = vpop.f32.mrb[17].mxu0  ;;  %v913_v53 = vld [vmem:[#allocation2 + $0x48] ss:$4 sm:$0xff] }
  0xff   :  { %v564_v8 = vadd.f32 %v2605_v3, %v3325_v21  ;;  %v558_v9 = vpop.f32.mrb[17].mxu1  ;;  %v419_v10 = vadd.f32 %v3325_v21, %v418_v5  ;;  %2726 = vrot.lane.b32.xlu1 %v2725_v63, %s2974_s16  ;;  %2716 = vrot.lane.b32.xlu0 %v2715_v0, %s2975_s21  ;;  %v1009_v54 = vld [vmem:[#allocation2 + $0x4b] ss:$4 sm:$0xff] }
 0x100   :  { %v559_v11 = vadd.f32 %v3325_v21, %v558_v9  ;;  %645 = vst.msk [vmem:[#allocation2 + $0x90] sm:$0xff] %vm617_vm2, %v424_v4 }
 0x101   :  { %673 = vst.msk [vmem:[#allocation2 + $0x198] sm:$0xff] %vm617_vm2, %v564_v8  ;;  %644 = vst.msk [vmem:[#allocation2 + $0x88] sm:$0xff] %vm617_vm2, %v419_v10  ;;  %v2566_v12 = vpop.f32.mrb[18].mxu0 }
 0x102   :  { %672 = vst.msk [vmem:[#allocation2 + $0x190] sm:$0xff] %vm617_vm2, %v559_v11  ;;  %v2608_v15 = vpop.f32.mrb[18].mxu1  ;;  %v434_v16 = vadd.f32 %v2566_v12, %v3325_v21  ;;  %v428_v17 = vpop.f32.mrb[19].mxu0 }
 0x103   :  { %v574_v20 = vadd.f32 %v2608_v15, %v3325_v21  ;;  %v568_v22 = vpop.f32.mrb[19].mxu1  ;;  %v429_v23 = vadd.f32 %v3325_v21, %v428_v17  ;;  %2736 = vrot.lane.b32.xlu1 %v2735_v13, %s2973_s15  ;;  %2721 = vrot.lane.b32.xlu0 %v2720_v14, %s2974_s16 }
 0x104   :  { %v569_v24 = vadd.f32 %v3325_v21, %v568_v22  ;;  %647 = vst.msk [vmem:[#allocation2 + $0xa0] sm:$0xff] %vm617_vm2, %v434_v16  ;;  %v851_v26 = vld [vmem:[#allocation2 + $0x66] ss:$4 sm:$0xff]  ;;  %v883_v33 = vld [vmem:[#allocation2 + $0x67] ss:$4 sm:$0xff] }
 0x105   :  { %675 = vst.msk [vmem:[#allocation2 + $0x1a8] sm:$0xff] %vm617_vm2, %v574_v20  ;;  %646 = vst.msk [vmem:[#allocation2 + $0x98] sm:$0xff] %vm617_vm2, %v429_v23  ;;  %v2569_v27 = vpop.f32.mrb[20].mxu0  ;;  %v2740_v28 = vpack.i.bf16 %v851_v26, %v849_v25  ;;  %v979_v34 = vld [vmem:[#allocation2 + $0x6a] ss:$4 sm:$0xff]  ;;  %v2750_v42 = vpack.i.bf16 %v883_v33, %v881_v39 }
 0x106   :  { %674 = vst.msk [vmem:[#allocation2 + $0x1a0] sm:$0xff] %vm617_vm2, %v569_v24  ;;  %v2611_v30 = vpop.f32.mrb[20].mxu1  ;;  %v444_v31 = vadd.f32 %v2569_v27, %v3325_v21  ;;  %v438_v32 = vpop.f32.mrb[21].mxu0  ;;  %v2745_v43 = vpack.i.bf16 %v979_v34, %v977_v40  ;;  %v915_v47 = vld [vmem:[#allocation2 + $0x68] ss:$4 sm:$0xff] }
 0x107   :  { %v584_v35 = vadd.f32 %v2611_v30, %v3325_v21  ;;  %v578_v36 = vpop.f32.mrb[21].mxu1  ;;  %v439_v37 = vadd.f32 %v3325_v21, %v438_v32  ;;  %2741 = vrot.lane.b32.xlu1 %v2740_v28, %s2974_s16  ;;  %2731 = vrot.lane.b32.xlu0 %v2730_v29, %s2973_s15  ;;  %v1011_v48 = vld [vmem:[#allocation2 + $0x6b] ss:$4 sm:$0xff]  ;;  %v2760_v56 = vpack.i.bf16 %v915_v47, %v913_v53  ;;  %v987_v29 = vld [vmem:[#allocation2 + $0xea] ss:$4 sm:$0xff] }
 0x108   :  { %v579_v38 = vadd.f32 %v3325_v21, %v578_v36  ;;  %649 = vst.msk [vmem:[#allocation2 + $0xb0] sm:$0xff] %vm617_vm2, %v444_v31  ;;  %v2755_v57 = vpack.i.bf16 %v1011_v48, %v1009_v54  ;;  %v899_v47 = vld [vmem:[#allocation2 + $0x16f] ss:$4 sm:$0xff]  ;;  %v993_v48 = vld [vmem:[#allocation2 + $0x152] ss:$4 sm:$0xff] }
 0x109   :  { %677 = vst.msk [vmem:[#allocation2 + $0x1b8] sm:$0xff] %vm617_vm2, %v584_v35  ;;  %648 = vst.msk [vmem:[#allocation2 + $0xa8] sm:$0xff] %vm617_vm2, %v439_v37  ;;  %v2572_v41 = vpop.f32.mrb[22].mxu0  ;;  %v923_v35 = vld [vmem:[#allocation2 + $0xe8] ss:$4 sm:$0xff] }
 0x10a   :  { %676 = vst.msk [vmem:[#allocation2 + $0x1b0] sm:$0xff] %vm617_vm2, %v579_v38  ;;  %v2614_v44 = vpop.f32.mrb[22].mxu1  ;;  %v454_v45 = vadd.f32 %v2572_v41, %v3325_v21  ;;  %v448_v46 = vpop.f32.mrb[23].mxu0  ;;  %v1019_v38 = vld [vmem:[#allocation2 + $0xeb] ss:$4 sm:$0xff] }
 0x10b   :  { %v594_v49 = vadd.f32 %v2614_v44, %v3325_v21  ;;  %v588_v50 = vpop.f32.mrb[23].mxu1  ;;  %v449_v51 = vadd.f32 %v3325_v21, %v448_v46  ;;  %2751 = vrot.lane.b32.xlu1 %v2750_v42, %s2973_s15  ;;  %2746 = vrot.lane.b32.xlu0 %v2745_v43, %s2974_s16  ;;  %v867_v41 = vld [vmem:[#allocation2 + $0x16e] ss:$4 sm:$0xff]  ;;  %v925_v42 = vld [vmem:[#allocation2 + $0x110] ss:$4 sm:$0xff] }
 0x10c   :  { %v589_v52 = vadd.f32 %v3325_v21, %v588_v50  ;;  %651 = vst.msk [vmem:[#allocation2 + $0xc0] sm:$0xff] %vm617_vm2, %v454_v45  ;;  %v981_v10 = vld [vmem:[#allocation2 + $0x8a] ss:$4 sm:$0xff]  ;;  %v885_v19 = vld [vmem:[#allocation2 + $0x87] ss:$4 sm:$0xff] }
 0x10d   :  { %679 = vst.msk [vmem:[#allocation2 + $0x1c8] sm:$0xff] %vm617_vm2, %v594_v49  ;;  %650 = vst.msk [vmem:[#allocation2 + $0xb8] sm:$0xff] %vm617_vm2, %v449_v51  ;;  %v2575_v55 = vpop.f32.mrb[24].mxu0  ;;  %v853_v13 = vld [vmem:[#allocation2 + $0x86] ss:$4 sm:$0xff] }
 0x10e   :  { %678 = vst.msk [vmem:[#allocation2 + $0x1c0] sm:$0xff] %vm617_vm2, %v589_v52  ;;  %v2617_v58 = vpop.f32.mrb[24].mxu1  ;;  %v464_v59 = vadd.f32 %v2575_v55, %v3325_v21  ;;  %v458_v62 = vpop.f32.mrb[25].mxu0  ;;  %v917_v26 = vld [vmem:[#allocation2 + $0x88] ss:$4 sm:$0xff] }
 0x10f   :  { %v604_v63 = vadd.f32 %v2617_v58, %v3325_v21  ;;  %v598_v0 = vpop.f32.mrb[25].mxu1  ;;  %v459_v1 = vadd.f32 %v3325_v21, %v458_v62  ;;  %2761 = vrot.lane.b32.xlu1 %v2760_v56, %s2975_s21  ;;  %2756 = vrot.lane.b32.xlu0 %v2755_v57, %s2973_s15  ;;  %v927_v43 = vld [vmem:[#allocation2 + $0x130] ss:$4 sm:$0xff]  ;;  %v865_v44 = vld [vmem:[#allocation2 + $0x14e] ss:$4 sm:$0xff] }
 0x110   :  { %v599_v2 = vadd.f32 %v3325_v21, %v598_v0  ;;  %653 = vst.msk [vmem:[#allocation2 + $0xd0] sm:$0xff] %vm617_vm2, %v464_v59  ;;  %v2820_v45 = vpack.i.bf16 %v867_v41, %v865_v44  ;;  %v2810_v46 = vpack.i.bf16 %v927_v43, %v925_v42  ;;  %v995_v49 = vld [vmem:[#allocation2 + $0x172] ss:$4 sm:$0xff]  ;;  %v897_v50 = vld [vmem:[#allocation2 + $0x14f] ss:$4 sm:$0xff] }
 0x111   :  { %681 = vst.msk [vmem:[#allocation2 + $0x1d8] sm:$0xff] %vm617_vm2, %v604_v63  ;;  %652 = vst.msk [vmem:[#allocation2 + $0xc8] sm:$0xff] %vm617_vm2, %v459_v1  ;;  %v2578_v3 = vpop.f32.mrb[26].mxu0  ;;  %v2830_v51 = vpack.i.bf16 %v899_v47, %v897_v50  ;;  %v2825_v52 = vpack.i.bf16 %v995_v49, %v993_v48  ;;  %v929_v53 = vld [vmem:[#allocation2 + $0x150] ss:$4 sm:$0xff] }
 0x112   :  { %680 = vst.msk [vmem:[#allocation2 + $0x1d0] sm:$0xff] %vm617_vm2, %v599_v2  ;;  %v2620_v4 = vpop.f32.mrb[26].mxu1  ;;  %v474_v5 = vadd.f32 %v2578_v3, %v3325_v21  ;;  %v468_v6 = vpop.f32.mrb[27].mxu0  ;;  %v931_v54 = vld [vmem:[#allocation2 + $0x170] ss:$4 sm:$0xff] }
 0x113   :  { %v614_v7 = vadd.f32 %v2620_v4, %v3325_v21  ;;  %v608_v8 = vpop.f32.mrb[27].mxu1  ;;  %v469_v9 = vadd.f32 %v3325_v21, %v468_v6  ;;  %v1025_v55 = vld [vmem:[#allocation2 + $0x153] ss:$4 sm:$0xff]  ;;  %v2840_v57 = vpack.i.bf16 %v931_v54, %v929_v53  ;;  %v997_v59 = vld [vmem:[#allocation2 + $0x192] ss:$4 sm:$0xff] }
 0x114   :  { %v609_v11 = vadd.f32 %v3325_v21, %v608_v8  ;;  %655 = vst.msk [vmem:[#allocation2 + $0xe0] sm:$0xff] %vm617_vm2, %v474_v5  ;;  %v983_v12 = vld [vmem:[#allocation2 + $0xaa] ss:$4 sm:$0xff]  ;;  %v1015_v17 = vld [vmem:[#allocation2 + $0xab] ss:$4 sm:$0xff] }
 0x115   :  { %v855_v14 = vld [vmem:[#allocation2 + $0xa6] ss:$4 sm:$0xff]  ;;  %683 = vst.msk [vmem:[#allocation2 + $0x1e8] sm:$0xff] %vm617_vm2, %v614_v7  ;;  %654 = vst.msk [vmem:[#allocation2 + $0xd8] sm:$0xff] %vm617_vm2, %v469_v9  ;;  %v2770_v15 = vpack.i.bf16 %v983_v12, %v981_v10  ;;  %v887_v18 = vld [vmem:[#allocation2 + $0xa7] ss:$4 sm:$0xff] }
 0x116   :  { %v2765_v16 = vpack.i.bf16 %v855_v14, %v853_v13  ;;  %682 = vst.msk [vmem:[#allocation2 + $0x1e0] sm:$0xff] %vm617_vm2, %v609_v11  ;;  %v1013_v21 = vld [vmem:[#allocation2 + $0x8b] ss:$4 sm:$0xff]  ;;  %v2775_v22 = vpack.i.bf16 %v887_v18, %v885_v19  ;;  %v919_v23 = vld [vmem:[#allocation2 + $0xa8] ss:$4 sm:$0xff] }
 0x117   :  { %2771 = vrot.lane.b32.xlu1 %v2770_v15, %s2974_s16  ;;  %v2780_v20 = vpack.i.bf16 %v1015_v17, %v1013_v21  ;;  %v2785_v28 = vpack.i.bf16 %v919_v23, %v917_v26  ;;  %v1027_v56 = vld [vmem:[#allocation2 + $0x173] ss:$4 sm:$0xff]  ;;  %v999_v62 = vld [vmem:[#allocation2 + $0x1b2] ss:$4 sm:$0xff]  ;;  %v933_v9 = vld [vmem:[#allocation2 + $0x190] ss:$4 sm:$0xff] }
 0x118   :  { %2766 = vrot.lane.b32.xlu0 %v2765_v16, %s2974_s16  ;;  %v2835_v58 = vpack.i.bf16 %v1027_v56, %v1025_v55  ;;  %v869_v63 = vld [vmem:[#allocation2 + $0x18e] ss:$4 sm:$0xff]  ;;  %v2850_v1 = vpack.i.bf16 %v999_v62, %v997_v59  ;;  %v1029_v3 = vld [vmem:[#allocation2 + $0x193] ss:$4 sm:$0xff]  ;;  %v935_v12 = vld [vmem:[#allocation2 + $0x1b0] ss:$4 sm:$0xff] }
 0x119   :  { %v871_v0 = vld [vmem:[#allocation2 + $0x1ae] ss:$4 sm:$0xff]  ;;  %v1031_v4 = vld [vmem:[#allocation2 + $0x1b3] ss:$4 sm:$0xff]  ;;  %v2865_v14 = vpack.i.bf16 %v935_v12, %v933_v9  ;;  %v815_v41 = vld [vmem:[#allocation2 + $0x25] ss:$4 sm:$0xff] }
 0x11a   :  { %v2845_v2 = vpack.i.bf16 %v871_v0, %v869_v63  ;;  %v901_v5 = vld [vmem:[#allocation2 + $0x18f] ss:$4 sm:$0xff]  ;;  %v2860_v7 = vpack.i.bf16 %v1031_v4, %v1029_v3  ;;  %v1003_v15 = vld [vmem:[#allocation2 + $0x1f2] ss:$4 sm:$0xff]  ;;  %v943_v42 = vld [vmem:[#allocation2 + $0x29] ss:$4 sm:$0xff] }
 0x11b   :  { %2781 = vrot.lane.b32.xlu1 %v2780_v20, %s2973_s15  ;;  %v859_v24 = vld [vmem:[#allocation2 + $0xe6] ss:$4 sm:$0xff]  ;;  %v891_v31 = vld [vmem:[#allocation2 + $0xe7] ss:$4 sm:$0xff]  ;;  %v939_v20 = vld [vmem:[#allocation2 + $0x1f0] ss:$4 sm:$0xff] }
 0x11c   :  { %2776 = vrot.lane.b32.xlu0 %v2775_v22, %s2973_s15  ;;  %v857_v25 = vld [vmem:[#allocation2 + $0xc6] ss:$4 sm:$0xff]  ;;  %v889_v30 = vld [vmem:[#allocation2 + $0xc7] ss:$4 sm:$0xff]  ;;  %v921_v36 = vld [vmem:[#allocation2 + $0xc8] ss:$4 sm:$0xff] }
 0x11d   :  { %v2790_v27 = vpack.i.bf16 %v859_v24, %v857_v25  ;;  %v985_v32 = vld [vmem:[#allocation2 + $0xca] ss:$4 sm:$0xff]  ;;  %v2800_v33 = vpack.i.bf16 %v891_v31, %v889_v30  ;;  %v1017_v37 = vld [vmem:[#allocation2 + $0xcb] ss:$4 sm:$0xff]  ;;  %v2815_v39 = vpack.i.bf16 %v923_v35, %v921_v36  ;;  %v937_v22 = vld [vmem:[#allocation2 + $0x1d0] ss:$4 sm:$0xff] }
 0x11e   :  { %v2795_v34 = vpack.i.bf16 %v987_v29, %v985_v32  ;;  %v2805_v40 = vpack.i.bf16 %v1019_v38, %v1017_v37  ;;  %v903_v6 = vld [vmem:[#allocation2 + $0x1af] ss:$4 sm:$0xff]  ;;  %v873_v10 = vld [vmem:[#allocation2 + $0x1ce] ss:$4 sm:$0xff]  ;;  %v2890_v25 = vpack.i.bf16 %v939_v20, %v937_v22  ;;  %v941_v36 = vld [vmem:[#allocation2 + $0x9] ss:$4 sm:$0xff] }
 0x11f   :  { %2791 = vrot.lane.b32.xlu1 %v2790_v27, %s2974_s16  ;;  %v2855_v8 = vpack.i.bf16 %v903_v6, %v901_v5  ;;  %v875_v11 = vld [vmem:[#allocation2 + $0x1ee] ss:$4 sm:$0xff]  ;;  %v905_v16 = vld [vmem:[#allocation2 + $0x1cf] ss:$4 sm:$0xff]  ;;  %v817_v9 = vld [vmem:[#allocation2 + $0x45] ss:$4 sm:$0xff] }
 0x120   :  { %2786 = vrot.lane.b32.xlu0 %v2785_v28, %s2975_s21  ;;  %v2870_v13 = vpack.i.bf16 %v875_v11, %v873_v10  ;;  %v907_v17 = vld [vmem:[#allocation2 + $0x1ef] ss:$4 sm:$0xff]  ;;  %v1001_v18 = vld [vmem:[#allocation2 + $0x1d2] ss:$4 sm:$0xff]  ;;  %v819_v10 = vld [vmem:[#allocation2 + $0x65] ss:$4 sm:$0xff] }
 0x121   :  { %v2880_v21 = vpack.i.bf16 %v907_v17, %v905_v16  ;;  %v2875_v19 = vpack.i.bf16 %v1003_v15, %v1001_v18  ;;  %v1033_v23 = vld [vmem:[#allocation2 + $0x1d3] ss:$4 sm:$0xff]  ;;  %v945_v15 = vld [vmem:[#allocation2 + $0x49] ss:$4 sm:$0xff] }
 0x122   :  { %v1035_v24 = vld [vmem:[#allocation2 + $0x1f3] ss:$4 sm:$0xff]  ;;  %v947_v16 = vld [vmem:[#allocation2 + $0x69] ss:$4 sm:$0xff] }
 0x123   :  { %2801 = vrot.lane.b32.xlu1 %v2800_v33, %s2973_s15  ;;  %v2885_v26 = vpack.i.bf16 %v1035_v24, %v1033_v23  ;;  %v813_v33 = vld [vmem:[#allocation2 + $0x5] ss:$4 sm:$0xff] }
 0x124   :  { %2796 = vrot.lane.b32.xlu0 %v2795_v34, %s2974_s16 }
 0x127   :  { %2816 = vrot.lane.b32.xlu1 %v2815_v39, %s2975_s21 }
 0x128   :  { %2806 = vrot.lane.b32.xlu0 %v2805_v40, %s2973_s15 }
 0x12b   :  { %2821 = vrot.lane.b32.xlu1 %v2820_v45, %s2974_s16 }
 0x12c   :  { %2811 = vrot.lane.b32.xlu0 %v2810_v46, %s2975_s21 }
 0x12f   :  { %2831 = vrot.lane.b32.xlu1 %v2830_v51, %s2973_s15 }
 0x130   :  { %2826 = vrot.lane.b32.xlu0 %v2825_v52, %s2974_s16 }
 0x133   :  { %2841 = vrot.lane.b32.xlu1 %v2840_v57, %s2975_s21 }
 0x134   :  { %2836 = vrot.lane.b32.xlu0 %v2835_v58, %s2973_s15 }
 0x137   :  { %2851 = vrot.lane.b32.xlu1 %v2850_v1, %s2974_s16 }
 0x138   :  { %2846 = vrot.lane.b32.xlu0 %v2845_v2, %s2974_s16 }
 0x13b   :  { %2861 = vrot.lane.b32.xlu1 %v2860_v7, %s2973_s15 }
 0x13c   :  { %2856 = vrot.lane.b32.xlu0 %v2855_v8, %s2973_s15 }
 0x13f   :  { %2871 = vrot.lane.b32.xlu1 %v2870_v13, %s2974_s16 }
 0x140   :  { %2866 = vrot.lane.b32.xlu0 %v2865_v14, %s2975_s21 }
 0x143   :  { %2881 = vrot.lane.b32.xlu1 %v2880_v21, %s2973_s15 }
 0x144   :  { %2876 = vrot.lane.b32.xlu0 %v2875_v19, %s2974_s16 }
 0x147   :  { %2891 = vrot.lane.b32.xlu1 %v2890_v25, %s2975_s21 }
 0x148   :  { %2886 = vrot.lane.b32.xlu0 %v2885_v26, %s2973_s15 }
 0x169   :  { %v2707_v27 = vpop.permute.xlu1 %2706  ;;  %v2697_v28 = vpop.permute.xlu0 %2696 }
 0x16a   :  { %v2699_v29 = vunpack.i.h.bf16 %v2697_v28  ;;  %v2698_v30 = vunpack.i.l.bf16 %v2697_v28  ;;  %v2709_v39 = vunpack.i.h.bf16 %v2707_v27  ;;  %v2708_v40 = vunpack.i.l.bf16 %v2707_v27 }
 0x16c   :  { %v1357_v43 = vsel %vm617_vm2, %v815_v41, %v2699_v29  ;;  %v1356_v44 = vsel %vm617_vm2, %v813_v33, %v2698_v30 }
 0x16d   :  { %v2712_v31 = vpop.permute.xlu1 %2711  ;;  %v2702_v32 = vpop.permute.xlu0 %2701  ;;  %v1373_v53 = vsel %vm1372_vm3, %v1356_v44, %v2708_v40  ;;  %v1374_v54 = vsel %vm1372_vm3, %v1357_v43, %v2709_v39 }
 0x16e   :  { %v2714_v34 = vunpack.i.h.bf16 %v2712_v31  ;;  %v2713_v35 = vunpack.i.l.bf16 %v2712_v31  ;;  %v2704_v37 = vunpack.i.h.bf16 %v2702_v32  ;;  %v2703_v38 = vunpack.i.l.bf16 %v2702_v32 }
 0x170   :  { %v1407_v45 = vsel %vm617_vm2, %v943_v42, %v2704_v37  ;;  %v1406_v46 = vsel %vm617_vm2, %v941_v36, %v2703_v38  ;;  %v949_v37 = vld [vmem:[#allocation2 + $0x89] ss:$4 sm:$0xff] }
 0x171   :  { %v3527_v47 = vpop.permute.xlu1 %2726  ;;  %v2717_v48 = vpop.permute.xlu0 %2716  ;;  %v1422_v49 = vsel %vm1372_vm3, %v1406_v46, %v2713_v35  ;;  %v1423_v50 = vsel %vm1372_vm3, %v1407_v45, %v2714_v34  ;;  %v951_v38 = vld [vmem:[#allocation2 + $0xa9] ss:$4 sm:$0xff] }
 0x172   :  { %v2719_v51 = vunpack.i.h.bf16 %v2717_v48  ;;  %v2718_v52 = vunpack.i.l.bf16 %v2717_v48  ;;  %v1439_v55 = vpack.c.bf16 %v1423_v50, %v1422_v49  ;;  %v821_v50 = vld [vmem:[#allocation2 + $0x85] ss:$4 sm:$0xff] }
 0x174   :  { %v1390_v56 = vsel %vm1389_vm4, %v1373_v53, %v2718_v52  ;;  %v1391_v57 = vsel %vm1389_vm4, %v1374_v54, %v2719_v51  ;;  %2441 = vmatprep.mubr.msk.bf16.mxu1 %vm1389_vm4, %v1439_v55  ;;  %v823_v51 = vld [vmem:[#allocation2 + $0xa5] ss:$4 sm:$0xff] }
 0x175   :  { %v1438_v58 = vpack.c.bf16 %v1391_v57, %v1390_v56  ;;  %v3536_v59 = vpop.permute.xlu1 %2736  ;;  %v3538_v62 = vpop.permute.xlu0 %2721 }
 0x177   :  { %1515 = vmatmul.mubr.bf16.vlgmr.msra.gmra.mrb[28].mxu1 %v1438_v58 }
 0x179   :  { %v2742_v63 = vpop.permute.xlu1 %2741  ;;  %v3540_v0 = vpop.permute.xlu0 %2731 }
 0x17a   :  { %v2744_v1 = vunpack.i.h.bf16 %v2742_v63  ;;  %v2743_v2 = vunpack.i.l.bf16 %v2742_v63  ;;  %v2729_v63 = vunpack.i.h.bf16 %v3527_v47 }
 0x17c   :  { %v1359_v11 = vsel %vm617_vm2, %v819_v10, %v2744_v1  ;;  %v1358_v12 = vsel %vm617_vm2, %v817_v9, %v2743_v2 }
 0x17d   :  { %v2752_v3 = vpop.permute.xlu1 %2751  ;;  %v2747_v4 = vpop.permute.xlu0 %2746 }
 0x17e   :  { %v2754_v5 = vunpack.i.h.bf16 %v2752_v3  ;;  %v2753_v6 = vunpack.i.l.bf16 %v2752_v3  ;;  %v2749_v7 = vunpack.i.h.bf16 %v2747_v4  ;;  %v2748_v8 = vunpack.i.l.bf16 %v2747_v4 }
 0x17f   :  { %v2728_v3 = vunpack.i.l.bf16 %v3527_v47  ;;  %v2739_v4 = vunpack.i.h.bf16 %v3536_v59 }
 0x180   :  { %v1375_v20 = vsel %vm1372_vm3, %v1358_v12, %v2753_v6  ;;  %v1376_v22 = vsel %vm1372_vm3, %v1359_v11, %v2754_v5  ;;  %v1409_v23 = vsel %vm617_vm2, %v947_v16, %v2749_v7  ;;  %v1408_v24 = vsel %vm617_vm2, %v945_v15, %v2748_v8 }
 0x181   :  { %v2762_v13 = vpop.permute.xlu1 %2761  ;;  %v2757_v14 = vpop.permute.xlu0 %2756  ;;  %v2738_v7 = vunpack.i.l.bf16 %v3536_v59  ;;  %v2723_v59 = vunpack.i.l.bf16 %v3538_v62 }
 0x182   :  { %v2764_v17 = vunpack.i.h.bf16 %v2762_v13  ;;  %v2763_v18 = vunpack.i.l.bf16 %v2762_v13  ;;  %v2759_v21 = vunpack.i.h.bf16 %v2757_v14  ;;  %v2758_v19 = vunpack.i.l.bf16 %v2757_v14  ;;  %v957_v13 = vld [vmem:[#allocation2 + $0x111] ss:$4 sm:$0xff] }
 0x183   :  { %v959_v14 = vld [vmem:[#allocation2 + $0x131] ss:$4 sm:$0xff] }
 0x184   :  { %v1424_v25 = vsel %vm1372_vm3, %v1408_v24, %v2758_v19  ;;  %v1425_v26 = vsel %vm1372_vm3, %v1409_v23, %v2759_v21  ;;  %v1392_v27 = vsel %vm1389_vm4, %v1375_v20, %v2763_v18  ;;  %v1393_v28 = vsel %vm1389_vm4, %v1376_v22, %v2764_v17  ;;  %v825_v20 = vld [vmem:[#allocation2 + $0xc5] ss:$4 sm:$0xff] }
 0x185   :  { %v1441_v29 = vpack.c.bf16 %v1425_v26, %v1424_v25  ;;  %v1440_v30 = vpack.c.bf16 %v1393_v28, %v1392_v27  ;;  %v1415_v47 = vsel %vm617_vm2, %v959_v14, %v2729_v63  ;;  %v1414_v21 = vsel %vm617_vm2, %v957_v13, %v2728_v3  ;;  %v827_v22 = vld [vmem:[#allocation2 + $0xe5] ss:$4 sm:$0xff] }
 0x186   :  { %v2724_v19 = vunpack.i.h.bf16 %v3538_v62  ;;  %v955_v23 = vld [vmem:[#allocation2 + $0xe9] ss:$4 sm:$0xff]  ;;  %v1430_v24 = vsel %vm1372_vm3, %v1414_v21, %v2738_v7  ;;  %v1431_v25 = vsel %vm1372_vm3, %v1415_v47, %v2739_v4 }
 0x187   :  { %2442 = vmatprep.mubr.msk.bf16.mxu1 %vm1389_vm4, %v1441_v29 }
 0x188   :  { %1523 = vmatmul.mubr.bf16.gmra.mrb[32].mxu1 %v1440_v30  ;;  %v953_v30 = vld [vmem:[#allocation2 + $0xc9] ss:$4 sm:$0xff] }
 0x189   :  { %v2772_v31 = vpop.permute.xlu1 %2771 }
 0x18a   :  { %v2767_v32 = vpop.permute.xlu0 %2766  ;;  %v2774_v33 = vunpack.i.h.bf16 %v2772_v31  ;;  %v2773_v34 = vunpack.i.l.bf16 %v2772_v31 }
 0x18b   :  { %v2769_v39 = vunpack.i.h.bf16 %v2767_v32  ;;  %v2768_v40 = vunpack.i.l.bf16 %v2767_v32 }
 0x18c   :  { %v1411_v43 = vsel %vm617_vm2, %v951_v38, %v2774_v33  ;;  %v1410_v44 = vsel %vm617_vm2, %v949_v37, %v2773_v34 }
 0x18d   :  { %v2782_v35 = vpop.permute.xlu1 %2781  ;;  %v1361_v55 = vsel %vm617_vm2, %v823_v51, %v2769_v39  ;;  %v1360_v56 = vsel %vm617_vm2, %v821_v50, %v2768_v40  ;;  %v1447_v51 = vpack.c.bf16 %v1431_v25, %v1430_v24 }
 0x18e   :  { %v2777_v36 = vpop.permute.xlu0 %2776  ;;  %v2784_v41 = vunpack.i.h.bf16 %v2782_v35  ;;  %v2783_v42 = vunpack.i.l.bf16 %v2782_v35 }
 0x18f   :  { %v2779_v45 = vunpack.i.h.bf16 %v2777_v36  ;;  %v2778_v46 = vunpack.i.l.bf16 %v2777_v36 }
 0x190   :  { %v1426_v48 = vsel %vm1372_vm3, %v1410_v44, %v2783_v42  ;;  %v1427_v49 = vsel %vm1372_vm3, %v1411_v43, %v2784_v41  ;;  %v2734_v42 = vunpack.i.h.bf16 %v3540_v0  ;;  %v2733_v43 = vunpack.i.l.bf16 %v3540_v0 }
 0x191   :  { %v1443_v52 = vpack.c.bf16 %v1427_v49, %v1426_v48  ;;  %v2792_v53 = vpop.permute.xlu1 %2791  ;;  %v1377_v1 = vsel %vm1372_vm3, %v1360_v56, %v2778_v46  ;;  %v1378_v2 = vsel %vm1372_vm3, %v1361_v55, %v2779_v45 }
 0x192   :  { %v2787_v54 = vpop.permute.xlu0 %2786  ;;  %v2794_v8 = vunpack.i.h.bf16 %v2792_v53  ;;  %v2793_v9 = vunpack.i.l.bf16 %v2792_v53  ;;  %v831_v53 = vld [vmem:[#allocation2 + $0x12d] ss:$4 sm:$0xff] }
 0x193   :  { %v2789_v57 = vunpack.i.h.bf16 %v2787_v54  ;;  %v2788_v58 = vunpack.i.l.bf16 %v2787_v54  ;;  %2443 = vmatprep.mubr.msk.bf16.mxu1 %vm1389_vm4, %v1443_v52  ;;  %v829_v52 = vld [vmem:[#allocation2 + $0x10d] ss:$4 sm:$0xff]  ;;  %v1365_v54 = vsel %vm617_vm2, %v831_v53, %v2724_v19 }
 0x194   :  { %v1363_v26 = vsel %vm617_vm2, %v827_v22, %v2794_v8  ;;  %v1362_v27 = vsel %vm617_vm2, %v825_v20, %v2793_v9  ;;  %v1364_v55 = vsel %vm617_vm2, %v829_v52, %v2723_v59  ;;  %v1382_v0 = vsel %vm1372_vm3, %v1365_v54, %v2734_v42 }
 0x195   :  { %v1394_v5 = vsel %vm1389_vm4, %v1377_v1, %v2788_v58  ;;  %v1395_v6 = vsel %vm1389_vm4, %v1378_v2, %v2789_v57  ;;  %v2802_v10 = vpop.permute.xlu1 %2801  ;;  %v1381_v56 = vsel %vm1372_vm3, %v1364_v55, %v2733_v43 }
 0x196   :  { %v2797_v11 = vpop.permute.xlu0 %2796  ;;  %v1442_v12 = vpack.c.bf16 %v1395_v6, %v1394_v5  ;;  %v2804_v15 = vunpack.i.h.bf16 %v2802_v10  ;;  %v2803_v16 = vunpack.i.l.bf16 %v2802_v10 }
 0x197   :  { %v2799_v17 = vunpack.i.h.bf16 %v2797_v11  ;;  %v2798_v18 = vunpack.i.l.bf16 %v2797_v11  ;;  %v961_v11 = vld [vmem:[#allocation2 + $0x151] ss:$4 sm:$0xff] }
 0x198   :  { %1531 = vmatmul.mubr.bf16.gmra.mrb[36].mxu1 %v1442_v12  ;;  %v1379_v62 = vsel %vm1372_vm3, %v1362_v27, %v2803_v16  ;;  %v1380_v35 = vsel %vm1372_vm3, %v1363_v26, %v2804_v15  ;;  %v963_v12 = vld [vmem:[#allocation2 + $0x171] ss:$4 sm:$0xff] }
 0x199   :  { %v2817_v28 = vpop.permute.xlu1 %2816  ;;  %v1413_v36 = vsel %vm617_vm2, %v955_v23, %v2799_v17  ;;  %v1412_v37 = vsel %vm617_vm2, %v953_v30, %v2798_v18  ;;  %v833_v17 = vld [vmem:[#allocation2 + $0x14d] ss:$4 sm:$0xff] }
 0x19a   :  { %v2807_v29 = vpop.permute.xlu0 %2806  ;;  %v2819_v31 = vunpack.i.h.bf16 %v2817_v28  ;;  %v2818_v32 = vunpack.i.l.bf16 %v2817_v28  ;;  %v835_v18 = vld [vmem:[#allocation2 + $0x16d] ss:$4 sm:$0xff] }
 0x19b   :  { %v2809_v33 = vunpack.i.h.bf16 %v2807_v29  ;;  %v2808_v34 = vunpack.i.l.bf16 %v2807_v29 }
 0x19c   :  { %v1396_v40 = vsel %vm1389_vm4, %v1379_v62, %v2818_v32  ;;  %v1397_v41 = vsel %vm1389_vm4, %v1380_v35, %v2819_v31  ;;  %v965_v62 = vld [vmem:[#allocation2 + $0x191] ss:$4 sm:$0xff] }
 0x19d   :  { %v1428_v38 = vsel %vm1372_vm3, %v1412_v37, %v2808_v34  ;;  %v1429_v39 = vsel %vm1372_vm3, %v1413_v36, %v2809_v33  ;;  %v2822_v45 = vpop.permute.xlu1 %2821  ;;  %v1444_v48 = vpack.c.bf16 %v1397_v41, %v1396_v40  ;;  %v967_v35 = vld [vmem:[#allocation2 + $0x1b1] ss:$4 sm:$0xff] }
 0x19e   :  { %v1445_v44 = vpack.c.bf16 %v1429_v39, %v1428_v38  ;;  %v2812_v46 = vpop.permute.xlu0 %2811  ;;  %v2824_v4 = vunpack.i.h.bf16 %v2822_v45  ;;  %v2823_v5 = vunpack.i.l.bf16 %v2822_v45 }
 0x19f   :  { %v2814_v49 = vunpack.i.h.bf16 %v2812_v46  ;;  %v2813_v50 = vunpack.i.l.bf16 %v2812_v46  ;;  %v837_v46 = vld [vmem:[#allocation2 + $0x18d] ss:$4 sm:$0xff] }
 0x1a0   :  { %2444 = vmatprep.mubr.msk.bf16.mxu1 %vm1389_vm4, %v1445_v44  ;;  %v1367_v19 = vsel %vm617_vm2, %v835_v18, %v2824_v4  ;;  %v1366_v59 = vsel %vm617_vm2, %v833_v17, %v2823_v5 }
 0x1a1   :  { %1539 = vmatmul.mubr.bf16.gmra.mrb[40].mxu1 %v1444_v48  ;;  %v2832_v57 = vpop.permute.xlu1 %2831  ;;  %v1398_v63 = vsel %vm1389_vm4, %v1381_v56, %v2813_v50  ;;  %v1399_v1 = vsel %vm1389_vm4, %v1382_v0, %v2814_v49  ;;  %v839_v48 = vld [vmem:[#allocation2 + $0x1ad] ss:$4 sm:$0xff] }
 0x1a2   :  { %v2827_v58 = vpop.permute.xlu0 %2826  ;;  %2445 = vmatprep.mubr.msk.bf16.mxu1 %vm1389_vm4, %v1447_v51  ;;  %v2834_v6 = vunpack.i.h.bf16 %v2832_v57  ;;  %v2833_v7 = vunpack.i.l.bf16 %v2832_v57  ;;  %v1446_v10 = vpack.c.bf16 %v1399_v1, %v1398_v63 }
 0x1a3   :  { %v2829_v2 = vunpack.i.h.bf16 %v2827_v58  ;;  %v2828_v3 = vunpack.i.l.bf16 %v2827_v58 }
 0x1a4   :  { %v1383_v23 = vsel %vm1372_vm3, %v1366_v59, %v2833_v7  ;;  %v1384_v24 = vsel %vm1372_vm3, %v1367_v19, %v2834_v6 }
 0x1a5   :  { %v2842_v8 = vpop.permute.xlu1 %2841  ;;  %v1417_v47 = vsel %vm617_vm2, %v963_v12, %v2829_v2  ;;  %v1416_v21 = vsel %vm617_vm2, %v961_v11, %v2828_v3  ;;  %v971_v11 = vld [vmem:[#allocation2 + $0x1f1] ss:$4 sm:$0xff] }
 0x1a6   :  { %v2837_v9 = vpop.permute.xlu0 %2836  ;;  %v2844_v13 = vunpack.i.h.bf16 %v2842_v8  ;;  %v2843_v14 = vunpack.i.l.bf16 %v2842_v8 }
 0x1a7   :  { %v2839_v15 = vunpack.i.h.bf16 %v2837_v9  ;;  %v2838_v16 = vunpack.i.l.bf16 %v2837_v9  ;;  %v841_v9 = vld [vmem:[#allocation2 + $0x1cd] ss:$4 sm:$0xff] }
 0x1a8   :  { %v1400_v28 = vsel %vm1389_vm4, %v1383_v23, %v2843_v14  ;;  %v1401_v29 = vsel %vm1389_vm4, %v1384_v24, %v2844_v13 }
 0x1a9   :  { %v1432_v20 = vsel %vm1372_vm3, %v1416_v21, %v2838_v16  ;;  %v1433_v22 = vsel %vm1372_vm3, %v1417_v47, %v2839_v15  ;;  %1547 = vmatmul.mubr.bf16.gmra.mrb[44].mxu1 %v1446_v10  ;;  %v2852_v26 = vpop.permute.xlu1 %2851  ;;  %v1448_v34 = vpack.c.bf16 %v1401_v29, %v1400_v28  ;;  %v843_v10 = vld [vmem:[#allocation2 + $0x1ed] ss:$4 sm:$0xff] }
 0x1aa   :  { %v1449_v25 = vpack.c.bf16 %v1433_v22, %v1432_v20  ;;  %v2847_v27 = vpop.permute.xlu0 %2846  ;;  %v2854_v30 = vunpack.i.h.bf16 %v2852_v26  ;;  %v2853_v31 = vunpack.i.l.bf16 %v2852_v26  ;;  %v969_v16 = vld [vmem:[#allocation2 + $0x1d1] ss:$4 sm:$0xff] }
 0x1ab   :  { %v2849_v36 = vunpack.i.h.bf16 %v2847_v27  ;;  %v2848_v37 = vunpack.i.l.bf16 %v2847_v27 }
 0x1ac   :  { %2446 = vmatprep.mubr.msk.bf16.mxu1 %vm1389_vm4, %v1449_v25  ;;  %v1419_v40 = vsel %vm617_vm2, %v967_v35, %v2854_v30  ;;  %v1418_v41 = vsel %vm617_vm2, %v965_v62, %v2853_v31 }
 0x1ad   :  { %v2862_v32 = vpop.permute.xlu1 %2861  ;;  %v1369_v52 = vsel %vm617_vm2, %v839_v48, %v2849_v36  ;;  %v1368_v53 = vsel %vm617_vm2, %v837_v46, %v2848_v37  ;;  %v3630_v36 = vld [vmem:[%s4160_s2 + $0x1] ss:$0 sm:$0xff] }
 0x1ae   :  { %v2857_v33 = vpop.permute.xlu0 %2856  ;;  %v2864_v38 = vunpack.i.h.bf16 %v2862_v32  ;;  %v2863_v39 = vunpack.i.l.bf16 %v2862_v32 }
 0x1af   :  { %v2859_v42 = vunpack.i.h.bf16 %v2857_v33  ;;  %v2858_v43 = vunpack.i.l.bf16 %v2857_v33 }
 0x1b0   :  { %v1434_v44 = vsel %vm1372_vm3, %v1418_v41, %v2863_v39  ;;  %v1435_v45 = vsel %vm1372_vm3, %v1419_v40, %v2864_v38  ;;  %v2384_v41 = vld [vmem:[%s4159_s3 + $0xe0] sm:$0xff] }
 0x1b1   :  { %1555 = vmatmul.mubr.bf16.gmra.mrb[48].mxu1 %v1448_v34  ;;  %v1451_v49 = vpack.c.bf16 %v1435_v45, %v1434_v44  ;;  %v2872_v50 = vpop.permute.xlu1 %2871  ;;  %v1385_v56 = vsel %vm1372_vm3, %v1368_v53, %v2858_v43  ;;  %v1386_v0 = vsel %vm1372_vm3, %v1369_v52, %v2859_v42  ;;  %v2385_v42 = vld [vmem:[%s4159_s3 + $0xe8] sm:$0xff]  ;;  %v2386_v43 = vld [vmem:[%s4159_s3 + $0xf0] sm:$0xff]  ;;  %v2387_v45 = vld [vmem:[%s4159_s3 + $0xf8] sm:$0xff] }
 0x1b2   :  { %v2867_v51 = vpop.permute.xlu0 %2866  ;;  %v2874_v63 = vunpack.i.h.bf16 %v2872_v50  ;;  %v2873_v1 = vunpack.i.l.bf16 %v2872_v50  ;;  %v755_v44 = vpack.c.bf16 %v2385_v42, %v2384_v41  ;;  %v756_v53 = vpack.c.bf16 %v2387_v45, %v2386_v43 }
 0x1b3   :  { %v2869_v54 = vunpack.i.h.bf16 %v2867_v51  ;;  %v2868_v55 = vunpack.i.l.bf16 %v2867_v51  ;;  %2447 = vmatprep.mubr.msk.bf16.mxu1 %vm1389_vm4, %v1451_v49 }
 0x1b4   :  { %v1371_v12 = vsel %vm617_vm2, %v843_v10, %v2874_v63  ;;  %v1370_v13 = vsel %vm617_vm2, %v841_v9, %v2873_v1  ;;  %1926 = vmatpush1.bf16.msra.mxu0 %v755_v44  ;;  %v2389_v63 = vld [vmem:[%s4159_s3 + $0x108] sm:$0xff] }
 0x1b5   :  { %v1402_v57 = vsel %vm1389_vm4, %v1385_v56, %v2868_v55  ;;  %v1403_v58 = vsel %vm1389_vm4, %v1386_v0, %v2869_v54  ;;  %v2882_v2 = vpop.permute.xlu1 %2881  ;;  %1927 = vmatprep.subr.bf16.mxu0 %v2972_v61 }
 0x1b6   :  { %v2877_v3 = vpop.permute.xlu0 %2876  ;;  %v1450_v4 = vpack.c.bf16 %v1403_v58, %v1402_v57  ;;  %v2884_v5 = vunpack.i.h.bf16 %v2882_v2  ;;  %v2883_v6 = vunpack.i.l.bf16 %v2882_v2  ;;  %v2388_v58 = vld [vmem:[%s4159_s3 + $0x100] sm:$0xff] }
 0x1b7   :  { %v2879_v7 = vunpack.i.h.bf16 %v2877_v3  ;;  %v2878_v8 = vunpack.i.l.bf16 %v2877_v3 }
 0x1b8   :  { %v1387_v19 = vsel %vm1372_vm3, %v1370_v13, %v2883_v6  ;;  %v1388_v59 = vsel %vm1372_vm3, %v1371_v12, %v2884_v5  ;;  %1928 = vmatpush1.bf16.msra.mxu0 %v756_v53  ;;  %v2390_v12 = vld [vmem:[%s4159_s3 + $0x110] sm:$0xff]  ;;  %v2391_v13 = vld [vmem:[%s4159_s3 + $0x118] sm:$0xff]  ;;  %v2397_v53 = vld [vmem:[%s4159_s3 + $0x148] sm:$0xff] }
 0x1b9   :  { %1563 = vmatmul.mubr.bf16.gmra.mrb[52].mxu1 %v1450_v4  ;;  %v2892_v14 = vpop.permute.xlu1 %2891  ;;  %v1421_v20 = vsel %vm617_vm2, %v971_v11, %v2879_v7  ;;  %v1420_v22 = vsel %vm617_vm2, %v969_v16, %v2878_v8  ;;  %v757_v8 = vpack.c.bf16 %v2389_v63, %v2388_v58  ;;  %1929 = vmatprep.subr.bf16.mxu0 %v2972_v61 }
 0x1ba   :  { %v2887_v15 = vpop.permute.xlu0 %2886  ;;  %v2894_v17 = vunpack.i.h.bf16 %v2892_v14  ;;  %v2893_v18 = vunpack.i.l.bf16 %v2892_v14 }
 0x1bb   :  { %v2889_v47 = vunpack.i.h.bf16 %v2887_v15  ;;  %v2888_v21 = vunpack.i.l.bf16 %v2887_v15 }
 0x1bc   :  { %v1404_v25 = vsel %vm1389_vm4, %v1387_v19, %v2893_v18  ;;  %v1405_v26 = vsel %vm1389_vm4, %v1388_v59, %v2894_v17  ;;  %1930 = vmatpush1.bf16.msra.mxu0 %v757_v8 }
 0x1bd   :  { %v1436_v23 = vsel %vm1372_vm3, %v1420_v22, %v2888_v21  ;;  %v1437_v24 = vsel %vm1372_vm3, %v1421_v20, %v2889_v47  ;;  %v1452_v28 = vpack.c.bf16 %v1405_v26, %v1404_v25  ;;  %v758_v47 = vpack.c.bf16 %v2391_v13, %v2390_v12  ;;  %1931 = vmatprep.subr.bf16.mxu0 %v2972_v61  ;;  %v2392_v22 = vld [vmem:[%s4159_s3 + $0x120] sm:$0xff] }
 0x1be   :  { %v1453_v27 = vpack.c.bf16 %v1437_v24, %v1436_v23  ;;  %v2393_v23 = vld [vmem:[%s4159_s3 + $0x128] sm:$0xff] }
 0x1c0   :  { %2448 = vmatprep.mubr.msk.bf16.mxu1 %vm1389_vm4, %v1453_v27  ;;  %1932 = vmatpush1.bf16.msra.mxu0 %v758_v47  ;;  %v2401_v47 = vld [vmem:[%s4159_s3 + $0x168] sm:$0xff] }
 0x1c1   :  { %1571 = vmatmul.mubr.bf16.gmra.mrb[56].mxu1 %v1452_v28  ;;  %1933 = vmatprep.subr.bf16.mxu0 %v2972_v61 }
 0x24a   :  { %v1516_v29 = vpop.f32.mrb[28].mxu1 }
 0x24b   :  { %v1518_v30 = vpop.f32.mrb[29].mxu1  ;;  %v3636_v38 = vadd.f32 %v3630_v36, %v1516_v29 }
 0x24c   :  { %v1519_v31 = vpop.f32.mrb[30].mxu1 }
 0x24d   :  { %v1521_v32 = vpop.f32.mrb[31].mxu1  ;;  %v3633_v37 = vadd.f32 %v3630_v36, %v1519_v31  ;;  %v1617_v46 = vmul.f32 %v3636_v38, %v3636_v38  ;;  %v1579_v54 = vsel %vm617_vm2, %v3636_v38, 0.0 }
 0x24e   :  { %v759_v32 = vpack.c.bf16 %v2393_v23, %v2392_v22 }
 0x24f   :  { %v1618_v40 = vmul.f32 %v3633_v37, %v3633_v37  ;;  %v1580_v48 = vsel %vm617_vm2, %v3633_v37, 0.0  ;;  %v1633_v3 = vsel %vm617_vm2, %v1617_v46, 0.0 }
 0x250   :  { %v1581_v1 = vadd.f32 %v1580_v48, %v1579_v54  ;;  %1934 = vmatpush1.bf16.msra.mxu0 %v759_v32  ;;  %v2402_v32 = vld [vmem:[%s4159_s3 + $0x170] sm:$0xff] }
 0x251   :  { %v1634_v55 = vsel %vm617_vm2, %v1618_v40, 0.0  ;;  %1935 = vmatprep.subr.bf16.mxu0 %v2972_v61 }
 0x252   :  { %v1635_v6 = vadd.f32 %v1634_v55, %v1633_v3 }
 0x25b   :  { %v1524_v33 = vpop.f32.mrb[32].mxu1 }
 0x25c   :  { %v1526_v34 = vpop.f32.mrb[33].mxu1  ;;  %v3639_v39 = vadd.f32 %v3630_v36, %v1524_v33 }
 0x25d   :  { %v1527_v62 = vpop.f32.mrb[34].mxu1 }
 0x25e   :  { %v1529_v35 = vpop.f32.mrb[35].mxu1  ;;  %v1619_v49 = vmul.f32 %v3639_v39, %v3639_v39  ;;  %v3662_v50 = vadd.f32 %v3630_v36, %v1527_v62  ;;  %v1582_v56 = vsel %vm617_vm2, %v3639_v39, 0.0  ;;  %v2394_v62 = vld [vmem:[%s4159_s3 + $0x130] sm:$0xff] }
 0x25f   :  { %v1583_v7 = vadd.f32 %v1582_v56, %v1581_v1  ;;  %v2395_v35 = vld [vmem:[%s4159_s3 + $0x138] sm:$0xff] }
 0x260   :  { %v1636_v4 = vsel %vm617_vm2, %v1619_v49, 0.0  ;;  %v1620_v5 = vmul.f32 %v3662_v50, %v3662_v50  ;;  %v1584_v9 = vsel %vm617_vm2, %v3662_v50, 0.0  ;;  %v760_v46 = vpack.c.bf16 %v2395_v35, %v2394_v62 }
 0x261   :  { %v1637_v14 = vadd.f32 %v1636_v4, %v1635_v6  ;;  %v1585_v17 = vadd.f32 %v1584_v9, %v1583_v7  ;;  %v2398_v6 = vld [vmem:[%s4159_s3 + $0x150] sm:$0xff]  ;;  %v2399_v7 = vld [vmem:[%s4159_s3 + $0x158] sm:$0xff] }
 0x262   :  { %v1638_v15 = vsel %vm617_vm2, %v1620_v5, 0.0  ;;  %1936 = vmatpush1.bf16.msra.mxu0 %v760_v46  ;;  %v2405_v46 = vld [vmem:[%s4159_s3 + $0x188] sm:$0xff] }
 0x263   :  { %v1639_v24 = vadd.f32 %v1638_v15, %v1637_v14  ;;  %1937 = vmatprep.subr.bf16.mxu0 %v2972_v61  ;;  %v762_v14 = vpack.c.bf16 %v2399_v7, %v2398_v6 }
 0x26b   :  { %v1532_v51 = vpop.f32.mrb[36].mxu1 }
 0x26c   :  { %v1534_v52 = vpop.f32.mrb[37].mxu1  ;;  %v3670_v0 = vadd.f32 %v3630_v36, %v1532_v51 }
 0x26d   :  { %v1535_v57 = vpop.f32.mrb[38].mxu1  ;;  %v2396_v52 = vld [vmem:[%s4159_s3 + $0x140] sm:$0xff] }
 0x26e   :  { %v1537_v2 = vpop.f32.mrb[39].mxu1  ;;  %v1621_v10 = vmul.f32 %v3670_v0, %v3670_v0  ;;  %v3688_v11 = vadd.f32 %v3630_v36, %v1535_v57  ;;  %v1586_v16 = vsel %vm617_vm2, %v3670_v0, 0.0  ;;  %v761_v3 = vpack.c.bf16 %v2397_v53, %v2396_v52 }
 0x26f   :  { %v1587_v25 = vadd.f32 %v1586_v16, %v1585_v17 }
 0x270   :  { %v1640_v21 = vsel %vm617_vm2, %v1621_v10, 0.0  ;;  %v1622_v19 = vmul.f32 %v3688_v11, %v3688_v11  ;;  %v1588_v27 = vsel %vm617_vm2, %v3688_v11, 0.0  ;;  %1938 = vmatpush1.bf16.msra.mxu0 %v761_v3 }
 0x271   :  { %v1641_v31 = vadd.f32 %v1640_v21, %v1639_v24  ;;  %v1589_v40 = vadd.f32 %v1588_v27, %v1587_v25  ;;  %1939 = vmatprep.subr.bf16.mxu0 %v2972_v61 }
 0x272   :  { %v1642_v33 = vsel %vm617_vm2, %v1622_v19, 0.0 }
 0x273   :  { %v1643_v43 = vadd.f32 %v1642_v33, %v1641_v31  ;;  %v2403_v33 = vld [vmem:[%s4159_s3 + $0x178] sm:$0xff] }
 0x274   :  { %v1540_v18 = vpop.f32.mrb[40].mxu1  ;;  %1940 = vmatpush1.bf16.msra.mxu0 %v762_v14 }
 0x275   :  { %v3704_v59 = vadd.f32 %v3630_v36, %v1540_v18  ;;  %v1542_v20 = vpop.f32.mrb[41].mxu1  ;;  %v2400_v18 = vld [vmem:[%s4159_s3 + $0x160] sm:$0xff]  ;;  %1941 = vmatprep.subr.bf16.mxu0 %v2972_v61 }
 0x276   :  { %v1543_v26 = vpop.f32.mrb[42].mxu1  ;;  %v763_v27 = vpack.c.bf16 %v2401_v47, %v2400_v18 }
 0x277   :  { %v1623_v28 = vmul.f32 %v3704_v59, %v3704_v59  ;;  %v3718_v29 = vadd.f32 %v3630_v36, %v1543_v26  ;;  %v1545_v30 = vpop.f32.mrb[43].mxu1  ;;  %v1590_v34 = vsel %vm617_vm2, %v3704_v59, 0.0 }
 0x278   :  { %v1591_v44 = vadd.f32 %v1590_v34, %v1589_v40  ;;  %1942 = vmatpush1.bf16.msra.mxu0 %v763_v27 }
 0x279   :  { %v1644_v41 = vsel %vm617_vm2, %v1623_v28, 0.0  ;;  %v1624_v42 = vmul.f32 %v3718_v29, %v3718_v29  ;;  %v1592_v48 = vsel %vm617_vm2, %v3718_v29, 0.0  ;;  %1943 = vmatprep.subr.bf16.mxu0 %v2972_v61 }
 0x27a   :  { %v1645_v54 = vadd.f32 %v1644_v41, %v1643_v43  ;;  %v1593_v2 = vadd.f32 %v1592_v48, %v1591_v44 }
 0x27b   :  { %v1646_v56 = vsel %vm617_vm2, %v1624_v42, 0.0  ;;  %v764_v42 = vpack.c.bf16 %v2403_v33, %v2402_v32 }
 0x27c   :  { %v1548_v45 = vpop.f32.mrb[44].mxu1  ;;  %v1647_v8 = vadd.f32 %v1646_v56, %v1645_v54 }
 0x27d   :  { %v3736_v49 = vadd.f32 %v3630_v36, %v1548_v45  ;;  %v1550_v51 = vpop.f32.mrb[45].mxu1  ;;  %v2404_v45 = vld [vmem:[%s4159_s3 + $0x180] sm:$0xff]  ;;  %1944 = vmatpush1.bf16.msra.mxu0 %v764_v42 }
 0x27e   :  { %v1551_v55 = vpop.f32.mrb[46].mxu1  ;;  %v765_v56 = vpack.c.bf16 %v2405_v46, %v2404_v45  ;;  %1945 = vmatprep.subr.bf16.mxu0 %v2972_v61  ;;  %v1679_v46 = vlaneseq }
 0x27f   :  { %v1594_v57 = vsel %vm617_vm2, %v3736_v49, 0.0  ;;  %v1625_v58 = vmul.f32 %v3736_v49, %v3736_v49  ;;  %v3751_v63 = vadd.f32 %v3630_v36, %v1551_v55  ;;  %v1553_v1 = vpop.f32.mrb[47].mxu1 }
 0x280   :  { %v1595_v9 = vadd.f32 %v1594_v57, %v1593_v2 }
 0x281   :  { %v1648_v4 = vsel %vm617_vm2, %v1625_v58, 0.0  ;;  %v1626_v5 = vmul.f32 %v3751_v63, %v3751_v63  ;;  %v1596_v10 = vsel %vm617_vm2, %v3751_v63, 0.0  ;;  %1946 = vmatpush1.bf16.msra.mxu0 %v765_v56  ;;  %v29_v56 = vld [vmem:[%s4160_s2 + $0x3] sm:$0x1] }
 0x282   :  { %v1649_v12 = vadd.f32 %v1648_v4, %v1647_v8  ;;  %v1597_v21 = vadd.f32 %v1596_v10, %v1595_v9  ;;  %1947 = vmatprep.subr.bf16.mxu0 %v2972_v61 }
 0x283   :  { %v1650_v15 = vsel %vm617_vm2, %v1626_v5, 0.0 }
 0x284   :  { %v1556_v13 = vpop.f32.mrb[48].mxu1  ;;  %v1651_v25 = vadd.f32 %v1650_v15, %v1649_v12 }
 0x285   :  { %v3767_v16 = vadd.f32 %v3630_v36, %v1556_v13  ;;  %v1558_v17 = vpop.f32.mrb[49].mxu1 }
 0x286   :  { %v1559_v19 = vpop.f32.mrb[50].mxu1 }
 0x287   :  { %v1598_v20 = vsel %vm617_vm2, %v3767_v16, 0.0  ;;  %v1627_v22 = vmul.f32 %v3767_v16, %v3767_v16  ;;  %v3781_v23 = vadd.f32 %v3630_v36, %v1559_v19  ;;  %v1561_v24 = vpop.f32.mrb[51].mxu1 }
 0x288   :  { %v1599_v26 = vadd.f32 %v1598_v20, %v1597_v21 }
 0x289   :  { %v1652_v28 = vsel %vm617_vm2, %v1627_v22, 0.0  ;;  %v1600_v30 = vsel %vm617_vm2, %v3781_v23, 0.0  ;;  %v1628_v31 = vmul.f32 %v3781_v23, %v3781_v23 }
 0x28a   :  { %v1653_v34 = vadd.f32 %v1652_v28, %v1651_v25  ;;  %v1601_v62 = vadd.f32 %v1600_v30, %v1599_v26 }
 0x28b   :  { %v1654_v35 = vsel %vm617_vm2, %v1628_v31, 0.0 }
 0x28c   :  { %v1655_v40 = vadd.f32 %v1654_v35, %v1653_v34  ;;  %v1564_v41 = vpop.f32.mrb[52].mxu1 }
 0x28d   :  { %v3797_v43 = vadd.f32 %v3630_v36, %v1564_v41  ;;  %v1566_v44 = vpop.f32.mrb[53].mxu1 }
 0x28e   :  { %v1567_v48 = vpop.f32.mrb[54].mxu1 }
 0x28f   :  { %v1602_v51 = vsel %vm617_vm2, %v3797_v43, 0.0  ;;  %v1629_v52 = vmul.f32 %v3797_v43, %v3797_v43  ;;  %v3811_v53 = vadd.f32 %v3630_v36, %v1567_v48  ;;  %v1569_v54 = vpop.f32.mrb[55].mxu1  ;;  %v1680_v48 = vshrl.u32 %v1679_v46, 7  ;;  %v2406_v46 = vld [vmem:[%s4159_s3 + $0x190] sm:$0xff] }
 0x290   :  { %v1603_v55 = vadd.f32 %v1602_v51, %v1601_v62  ;;  %v28_v51 = vld [vmem:[%s4160_s2 + $0x2] sm:$0x1] }
 0x291   :  { %v1656_v57 = vsel %vm617_vm2, %v1629_v52, 0.0  ;;  %v1604_v58 = vsel %vm617_vm2, %v3811_v53, 0.0  ;;  %v1630_v1 = vmul.f32 %v3811_v53, %v3811_v53  ;;  %v3835_v52 = vsub.s32 0, %v1680_v48  ;;  %v2407_v48 = vld [vmem:[%s4159_s3 + $0x198] sm:$0xff] }
 0x292   :  { %v1657_v2 = vadd.f32 %v1656_v57, %v1655_v40  ;;  %v1605_v3 = vadd.f32 %v1604_v58, %v1603_v55 }
 0x293   :  { %v1658_v4 = vsel %vm617_vm2, %v1630_v1, 0.0 }
 0x294   :  { %v1659_v5 = vadd.f32 %v1658_v4, %v1657_v2  ;;  %v1572_v6 = vpop.f32.mrb[56].mxu1 }
 0x295   :  { %v3821_v7 = vadd.f32 %v3630_v36, %v1572_v6  ;;  %v1574_v8 = vpop.f32.mrb[57].mxu1 }
 0x296   :  { %v1575_v9 = vpop.f32.mrb[58].mxu1 }
 0x297   :  { %v1606_v10 = vsel %vm617_vm2, %v3821_v7, 0.0  ;;  %v1631_v12 = vmul.f32 %v3821_v7, %v3821_v7  ;;  %v1576_v13 = vadd.f32 %v3630_v36, %v1575_v9  ;;  %v1577_v14 = vpop.f32.mrb[59].mxu1 }
 0x298   :  { %v1607_v15 = vadd.f32 %v1606_v10, %v1605_v3 }
 0x299   :  { %v1660_v17 = vsel %vm617_vm2, %v1631_v12, 0.0  ;;  %v1608_v18 = vsel %vm617_vm2, %v1576_v13, 0.0  ;;  %v1632_v47 = vmul.f32 %v1576_v13, %v1576_v13 }
 0x29a   :  { %v1661_v21 = vadd.f32 %v1660_v17, %v1659_v5  ;;  %v1609_v19 = vadd.f32 %v1608_v18, %v1607_v15 }
 0x29b   :  { %v1662_v20 = vsel %vm617_vm2, %v1632_v47, 0.0 }
 0x29c   :  { %v1610_v22 = vrot.slane %v1609_v19, 4  ;;  %v1663_v24 = vadd.f32 %v1662_v20, %v1661_v21 }
 0x29e   :  { %v1611_v25 = vadd.f32 %v1610_v22, %v1609_v19  ;;  %v1664_v26 = vrot.slane %v1663_v24, 4 }
 0x2a0   :  { %v1612_v27 = vrot.slane %v1611_v25, 2  ;;  %v1665_v28 = vadd.f32 %v1664_v26, %v1663_v24 }
 0x2a2   :  { %v1613_v30 = vadd.f32 %v1612_v27, %v1611_v25  ;;  %v1666_v31 = vrot.slane %v1665_v28, 2 }
 0x2a4   :  { %v1614_v36 = vrot.slane %v1613_v30, 1  ;;  %v1667_v32 = vadd.f32 %v1666_v31, %v1665_v28 }
 0x2a6   :  { %v1615_v33 = vadd.f32 %v1614_v36, %v1613_v30  ;;  %v1668_v34 = vrot.slane %v1667_v32, 1 }
 0x2a8   :  { %v1616_v62 = vmul.f32 0.0078125, %v1615_v33  ;;  %v1669_v35 = vadd.f32 %v1668_v34, %v1667_v32 }
 0x2aa   :  { %v1670_v40 = vmul.f32 0.0078125, %v1669_v35  ;;  %v1671_v41 = vmul.f32 %v1616_v62, %v1616_v62 }
 0x2ac   :  { %v1672_v42 = vsub.f32 %v1670_v40, %v1671_v41 }
 0x2ae   :  { %v1673_v44 = vmax.f32 %v1672_v42, 0.0 }
 0x2b0   :  { %v1674_v45 = vadd.f32 1e-05, %v1673_v44 }
 0x2b2   :  { %2965 = vrsqrt.f32 %v1674_v45 }
 0x2bc   :  { %v2966_v54 = vpop.eup %2965 }
 0x2bd   :  { %v1676_v55 = vmul.f32 %v2966_v54, %v28_v51 }
 0x2bf   :  { %v1677_v57 = vmul.f32 %v1676_v55, %v1616_v62  ;;  %v1682_v58 = vrot.slane %v1676_v55, %v3835_v52 }
 0x2c1   :  { %v1678_v1 = vsub.f32 %v29_v56, %v1677_v57  ;;  %v1698_v2 = vmul.f32 %v1682_v58, %v1576_v13  ;;  %v1683_v3 = vmul.f32 %v1682_v58, %v3636_v38  ;;  %v1684_v4 = vmul.f32 %v1682_v58, %v3633_v37 }
 0x2c2   :  { %v1685_v5 = vmul.f32 %v1682_v58, %v3639_v39  ;;  %v1686_v6 = vmul.f32 %v1682_v58, %v3662_v50  ;;  %v1687_v8 = vmul.f32 %v1682_v58, %v3670_v0  ;;  %v1688_v9 = vmul.f32 %v1682_v58, %v3688_v11 }
 0x2c3   :  { %v1702_v10 = vrot.slane %v1678_v1, %v3835_v52  ;;  %v1689_v12 = vmul.f32 %v1682_v58, %v3704_v59  ;;  %v1690_v14 = vmul.f32 %v1682_v58, %v3718_v29  ;;  %v1691_v13 = vmul.f32 %v1682_v58, %v3736_v49 }
 0x2c4   :  { %v1692_v38 = vmul.f32 %v1682_v58, %v3751_v63  ;;  %v1693_v37 = vmul.f32 %v1682_v58, %v3767_v16  ;;  %v1694_v39 = vmul.f32 %v1682_v58, %v3781_v23  ;;  %v1695_v50 = vmul.f32 %v1682_v58, %v3797_v43 }
 0x2c5   :  { %v1718_v15 = vadd.f32 %v1702_v10, %v1698_v2  ;;  %v1703_v0 = vadd.f32 %v1702_v10, %v1683_v3  ;;  %v1704_v17 = vadd.f32 %v1702_v10, %v1684_v4  ;;  %v1705_v11 = vadd.f32 %v1702_v10, %v1685_v5  ;;  %v2408_v5 = vld [vmem:[%s4159_s3 + $0x1a0] sm:$0xff] }
 0x2c6   :  { %v1706_v18 = vadd.f32 %v1702_v10, %v1686_v6  ;;  %v1707_v47 = vadd.f32 %v1702_v10, %v1687_v8  ;;  %v1708_v21 = vadd.f32 %v1702_v10, %v1688_v9  ;;  %v1709_v59 = vadd.f32 %v1702_v10, %v1689_v12  ;;  %v2409_v6 = vld [vmem:[%s4159_s3 + $0x1a8] sm:$0xff] }
 0x2c7   :  { %vm1734_vm5 = vcmp.gt.f32.partialorder %v1718_v15, 0.0  ;;  %v1750_v29 = vmul.f32 0.2, %v1718_v15  ;;  %v1710_v19 = vadd.f32 %v1702_v10, %v1690_v14  ;;  %vm1719_vm6 = vcmp.gt.f32.partialorder %v1703_v0, 0.0 }
 0x2c8   :  { %vm1720_vm7 = vcmp.gt.f32.partialorder %v1704_v17, 0.0  ;;  %vm1721_vm8 = vcmp.gt.f32.partialorder %v1705_v11, 0.0  ;;  %vm1722_vm9 = vcmp.gt.f32.partialorder %v1706_v18, 0.0  ;;  %vm1723_vm10 = vcmp.gt.f32.partialorder %v1707_v47, 0.0 }
 0x2c9   :  { %v1766_v49 = vsel %vm1734_vm5, %v1718_v15, %v1750_v29  ;;  %vm1724_vm11 = vcmp.gt.f32.partialorder %v1708_v21, 0.0  ;;  %vm1725_vm12 = vcmp.gt.f32.partialorder %v1709_v59, 0.0  ;;  %vm1726_vm13 = vcmp.gt.f32.partialorder %v1710_v19, 0.0 }
 0x2ca   :  { %1782 = vst.msk [vmem:[#allocation2 + $0x148] sm:$0xff] %vm617_vm2, %v1766_v49  ;;  %v1735_v63 = vmul.f32 0.2, %v1703_v0  ;;  %v1736_v16 = vmul.f32 0.2, %v1704_v17  ;;  %v1696_v43 = vmul.f32 %v1682_v58, %v3811_v53  ;;  %v1697_v25 = vmul.f32 %v1682_v58, %v3821_v7 }
 0x2cb   :  { %v1737_v23 = vmul.f32 0.2, %v1705_v11  ;;  %v1738_v20 = vmul.f32 0.2, %v1706_v18  ;;  %v1739_v22 = vmul.f32 0.2, %v1707_v47  ;;  %v1711_v34 = vadd.f32 %v1702_v10, %v1691_v13 }
 0x2cc   :  { %v1740_v24 = vmul.f32 0.2, %v1708_v21  ;;  %v1741_v26 = vmul.f32 0.2, %v1709_v59  ;;  %v1742_v27 = vmul.f32 0.2, %v1710_v19  ;;  %v1751_v28 = vsel %vm1719_vm6, %v1703_v0, %v1735_v63 }
 0x2cd   :  { %v1752_v30 = vsel %vm1720_vm7, %v1704_v17, %v1736_v16  ;;  %v1753_v31 = vsel %vm1721_vm8, %v1705_v11, %v1737_v23  ;;  %v1754_v36 = vsel %vm1722_vm9, %v1706_v18, %v1738_v20  ;;  %v1755_v32 = vsel %vm1723_vm10, %v1707_v47, %v1739_v22  ;;  %1767 = vst.msk [vmem:[#allocation2 + $0x8] sm:$0xff] %vm617_vm2, %v1751_v28  ;;  %v2410_v47 = vld [vmem:[%s4159_s3 + $0x1b0] sm:$0xff] }
 0x2ce   :  { %v1756_v33 = vsel %vm1724_vm11, %v1708_v21, %v1740_v24  ;;  %1768 = vst.msk [vmem:[#allocation2 + $0x10] sm:$0xff] %vm617_vm2, %v1752_v30  ;;  %v1757_v53 = vsel %vm1725_vm12, %v1709_v59, %v1741_v26  ;;  %v1758_v7 = vsel %vm1726_vm13, %v1710_v19, %v1742_v27  ;;  %1769 = vst.msk [vmem:[#allocation2 + $0x18] sm:$0xff] %vm617_vm2, %v1753_v31  ;;  %vm1727_vm14 = vcmp.gt.f32.partialorder %v1711_v34, 0.0  ;;  %v2411_v21 = vld [vmem:[%s4159_s3 + $0x1b8] sm:$0xff] }
 0x2cf   :  { %1770 = vst.msk [vmem:[#allocation2 + $0x20] sm:$0xff] %vm617_vm2, %v1754_v36  ;;  %1771 = vst.msk [vmem:[#allocation2 + $0x28] sm:$0xff] %vm617_vm2, %v1755_v32  ;;  %v1712_v62 = vadd.f32 %v1702_v10, %v1692_v38  ;;  %v1713_v35 = vadd.f32 %v1702_v10, %v1693_v37  ;;  %v1714_v40 = vadd.f32 %v1702_v10, %v1694_v39  ;;  %v1743_v45 = vmul.f32 0.2, %v1711_v34 }
 0x2d0   :  { %1772 = vst.msk [vmem:[#allocation2 + $0x30] sm:$0xff] %vm617_vm2, %v1756_v33  ;;  %1773 = vst.msk [vmem:[#allocation2 + $0x38] sm:$0xff] %vm617_vm2, %v1757_v53  ;;  %v1715_v41 = vadd.f32 %v1702_v10, %v1695_v50  ;;  %v1716_v42 = vadd.f32 %v1702_v10, %v1696_v43  ;;  %v1717_v44 = vadd.f32 %v1702_v10, %v1697_v25  ;;  %vm2116_vm12 = vcmask 1043456  }
 0x2d1   :  { %1774 = vst.msk [vmem:[#allocation2 + $0x40] sm:$0xff] %vm617_vm2, %v1758_v7  ;;  %vm1728_vm15 = vcmp.gt.f32.partialorder %v1712_v62, 0.0  ;;  %vm1729_vm0 = vcmp.gt.f32.partialorder %v1713_v35, 0.0  ;;  %vm1730_vm1 = vcmp.gt.f32.partialorder %v1714_v40, 0.0  ;;  %v1744_v51 = vmul.f32 0.2, %v1712_v62 }
 0x2d2   :  { %vm1731_vm5 = vcmp.gt.f32.partialorder %v1715_v41, 0.0  ;;  %vm1732_vm6 = vcmp.gt.f32.partialorder %v1716_v42, 0.0  ;;  %vm1733_vm7 = vcmp.gt.f32.partialorder %v1717_v44, 0.0  ;;  %v1745_v54 = vmul.f32 0.2, %v1713_v35 }
 0x2d3   :  { %v1759_v55 = vsel %vm1727_vm14, %v1711_v34, %v1743_v45  ;;  %v1746_v56 = vmul.f32 0.2, %v1714_v40  ;;  %v1747_v57 = vmul.f32 0.2, %v1715_v41  ;;  %v1748_v58 = vmul.f32 0.2, %v1716_v42 }
 0x2d4   :  { %1775 = vst.msk [vmem:[#allocation2 + $0x110] sm:$0xff] %vm617_vm2, %v1759_v55  ;;  %v766_v1 = vpack.c.bf16 %v2407_v48, %v2406_v46  ;;  %v1749_v2 = vmul.f32 0.2, %v1717_v44  ;;  %v1760_v3 = vsel %vm1728_vm15, %v1712_v62, %v1744_v51  ;;  %v1761_v4 = vsel %vm1729_vm0, %v1713_v35, %v1745_v54 }
 0x2d5   :  { %v1762_v10 = vsel %vm1730_vm1, %v1714_v40, %v1746_v56  ;;  %v1763_v12 = vsel %vm1731_vm5, %v1715_v41, %v1747_v57  ;;  %v1764_v14 = vsel %vm1732_vm6, %v1716_v42, %v1748_v58  ;;  %1776 = vst.msk [vmem:[#allocation2 + $0x118] sm:$0xff] %vm617_vm2, %v1760_v3  ;;  %1777 = vst.msk [vmem:[#allocation2 + $0x120] sm:$0xff] %vm617_vm2, %v1761_v4  ;;  %vm2977_vm14 = vmmov 0  }
 0x2d6   :  { %v1803_v8 = vld [vmem:[#allocation2 + $0xa] ss:$4 sm:$0xff]  ;;  %1948 = vmatpush1.bf16.msra.mxu0 %v766_v1  ;;  %v1765_v37 = vsel %vm1733_vm7, %v1717_v44, %v1749_v2  ;;  %1778 = vst.msk [vmem:[#allocation2 + $0x128] sm:$0xff] %vm617_vm2, %v1762_v10  ;;  %1779 = vst.msk [vmem:[#allocation2 + $0x130] sm:$0xff] %vm617_vm2, %v1763_v12  ;;  %v767_v39 = vpack.c.bf16 %v2409_v6, %v2408_v5  ;;  %v1807_v0 = vld [vmem:[#allocation2 + $0xb] ss:$4 sm:$0xff]  ;;  %v768_v19 = vpack.c.bf16 %v2411_v21, %v2410_v47 }
 0x2d7   :  { %v1787_v9 = vld [vmem:[#allocation2 + $0x6] ss:$4 sm:$0xff]  ;;  %1780 = vst.msk [vmem:[#allocation2 + $0x138] sm:$0xff] %vm617_vm2, %v1764_v14  ;;  %1949 = vmatprep.subr.bf16.mxu0 %v2972_v61  ;;  %1781 = vst.msk [vmem:[#allocation2 + $0x140] sm:$0xff] %vm617_vm2, %v1765_v37  ;;  %v1791_v11 = vld [vmem:[#allocation2 + $0x7] ss:$4 sm:$0xff] }
 0x2d8   :  { %v1804_v13 = vld [vmem:[#allocation2 + $0x2a] ss:$4 sm:$0xff]  ;;  %v1808_v17 = vld [vmem:[#allocation2 + $0x2b] ss:$4 sm:$0xff]  ;;  %v1795_v49 = vld [vmem:[#allocation2 + $0x8] ss:$4 sm:$0xff] }
 0x2d9   :  { %v1788_v38 = vld [vmem:[#allocation2 + $0x26] ss:$4 sm:$0xff]  ;;  %v2900_v50 = vpack.i.bf16 %v1804_v13, %v1803_v8  ;;  %v1792_v18 = vld [vmem:[#allocation2 + $0x27] ss:$4 sm:$0xff]  ;;  %v2910_v59 = vpack.i.bf16 %v1808_v17, %v1807_v0  ;;  %v1796_v63 = vld [vmem:[#allocation2 + $0x28] ss:$4 sm:$0xff] }
 0x2da   :  { %v2895_v15 = vpack.i.bf16 %v1788_v38, %v1787_v9  ;;  %1950 = vmatpush1.bf16.msra.mxu0 %v767_v39  ;;  %v2905_v29 = vpack.i.bf16 %v1792_v18, %v1791_v11  ;;  %v2915_v20 = vpack.i.bf16 %v1796_v63, %v1795_v49  ;;  %v1800_v42 = vld [vmem:[#allocation2 + $0x29] ss:$4 sm:$0xff]  ;;  %vm2225_vm15 = vcmask 1040384  }
 0x2db   :  { %2901 = vrot.lane.b32.xlu1 %v2900_v50, %s2974_s16  ;;  %1951 = vmatprep.subr.bf16.mxu0 %v2972_v61  ;;  %v1799_v44 = vld [vmem:[#allocation2 + $0x9] ss:$4 sm:$0xff]  ;;  %vm2320_vm0 = vcmask 1024  }
 0x2dc   :  { %2896 = vrot.lane.b32.xlu0 %v2895_v15, %s2974_s16  ;;  %v1784_v2 = vld [vmem:[#allocation2 + $0x25] ss:$4 sm:$0xff] }
 0x2dd   :  { %v1789_v16 = vld [vmem:[#allocation2 + $0x10e] ss:$4 sm:$0xff]  ;;  %v1793_v22 = vld [vmem:[#allocation2 + $0x10f] ss:$4 sm:$0xff]  ;;  %v1797_v30 = vld [vmem:[#allocation2 + $0x110] ss:$4 sm:$0xff] }
 0x2de   :  { %v1790_v23 = vld [vmem:[#allocation2 + $0x12e] ss:$4 sm:$0xff]  ;;  %1952 = vmatpush1.bf16.msra.mxu0 %v768_v19  ;;  %v1794_v24 = vld [vmem:[#allocation2 + $0x12f] ss:$4 sm:$0xff]  ;;  %v1798_v31 = vld [vmem:[#allocation2 + $0x130] ss:$4 sm:$0xff] }
 0x2df   :  { %2911 = vrot.lane.b32.xlu1 %v2910_v59, %s2973_s15  ;;  %v2920_v43 = vpack.i.bf16 %v1790_v23, %v1789_v16  ;;  %v1805_v25 = vld [vmem:[#allocation2 + $0x112] ss:$4 sm:$0xff]  ;;  %v2930_v27 = vpack.i.bf16 %v1794_v24, %v1793_v22  ;;  %v1809_v36 = vld [vmem:[#allocation2 + $0x113] ss:$4 sm:$0xff]  ;;  %v2940_v33 = vpack.i.bf16 %v1798_v31, %v1797_v30  ;;  %v1783_v3 = vld [vmem:[#allocation2 + $0x5] ss:$4 sm:$0xff] }
 0x2e0   :  { %2906 = vrot.lane.b32.xlu0 %v2905_v29, %s2973_s15  ;;  %v1806_v26 = vld [vmem:[#allocation2 + $0x132] ss:$4 sm:$0xff]  ;;  %v1810_v32 = vld [vmem:[#allocation2 + $0x133] ss:$4 sm:$0xff]  ;;  %v1785_v59 = vld [vmem:[#allocation2 + $0x10d] ss:$4 sm:$0xff] }
 0x2e1   :  { %v2925_v28 = vpack.i.bf16 %v1806_v26, %v1805_v25  ;;  %v2935_v53 = vpack.i.bf16 %v1810_v32, %v1809_v36  ;;  %v1786_v29 = vld [vmem:[#allocation2 + $0x12d] ss:$4 sm:$0xff] }
 0x2e2   :  { %v1801_v23 = vld [vmem:[#allocation2 + $0x111] ss:$4 sm:$0xff] }
 0x2e3   :  { %2921 = vrot.lane.b32.xlu1 %v2920_v43, %s2974_s16  ;;  %v1802_v43 = vld [vmem:[#allocation2 + $0x131] ss:$4 sm:$0xff] }
 0x2e4   :  { %2916 = vrot.lane.b32.xlu0 %v2915_v20, %s2975_s21 }
 0x2e7   :  { %2931 = vrot.lane.b32.xlu1 %v2930_v27, %s2973_s15 }
 0x2e8   :  { %2926 = vrot.lane.b32.xlu0 %v2925_v28, %s2974_s16 }
 0x2eb   :  { %2941 = vrot.lane.b32.xlu1 %v2940_v33, %s2975_s21 }
 0x2ec   :  { %2936 = vrot.lane.b32.xlu0 %v2935_v53, %s2973_s15 }
 0x34d   :  { %v2902_v7 = vpop.permute.xlu1 %2901 }
 0x34e   :  { %v2897_v34 = vpop.permute.xlu0 %2896  ;;  %v2904_v62 = vunpack.i.h.bf16 %v2902_v7  ;;  %v2903_v35 = vunpack.i.l.bf16 %v2902_v7 }
 0x34f   :  { %v2899_v45 = vunpack.i.h.bf16 %v2897_v34  ;;  %v2898_v46 = vunpack.i.l.bf16 %v2897_v34  ;;  %v2412_v34 = vld [vmem:[%s4159_s3 + $0x1c0] sm:$0xff] }
 0x350   :  { %v1904_v54 = vsel %vm617_vm2, %v1800_v42, %v2904_v62  ;;  %v1903_v55 = vsel %vm617_vm2, %v1799_v44, %v2903_v35  ;;  %v2413_v62 = vld [vmem:[%s4159_s3 + $0x1c8] sm:$0xff]  ;;  %v2414_v35 = vld [vmem:[%s4159_s3 + $0x1d0] sm:$0xff]  ;;  %v2416_v44 = vld [vmem:[%s4159_s3 + $0x1e0] sm:$0xff] }
 0x351   :  { %v2912_v40 = vpop.permute.xlu1 %2911  ;;  %v1892_v8 = vsel %vm617_vm2, %v1784_v2, %v2899_v45  ;;  %v1891_v9 = vsel %vm617_vm2, %v1783_v3, %v2898_v46  ;;  %v2417_v45 = vld [vmem:[%s4159_s3 + $0x1e8] sm:$0xff]  ;;  %v2424_v3 = vld [vmem:[%s4159_s3 + $0x220] sm:$0xff] }
 0x352   :  { %v2907_v41 = vpop.permute.xlu0 %2906  ;;  %v2914_v48 = vunpack.i.h.bf16 %v2912_v40  ;;  %v2913_v51 = vunpack.i.l.bf16 %v2912_v40  ;;  %v798_v40 = vpack.c.bf16 %v2413_v62, %v2412_v34  ;;  %v800_v46 = vpack.c.bf16 %v2417_v45, %v2416_v44 }
 0x353   :  { %v2909_v56 = vunpack.i.h.bf16 %v2907_v41  ;;  %v2908_v57 = vunpack.i.l.bf16 %v2907_v41  ;;  %v2415_v41 = vld [vmem:[%s4159_s3 + $0x1d8] sm:$0xff] }
 0x354   :  { %v1907_v58 = vsel %vm1372_vm3, %v1903_v55, %v2913_v51  ;;  %v1908_v1 = vsel %vm1372_vm3, %v1904_v54, %v2914_v48  ;;  %2129 = vmatpush1.bf16.msra.mxu1 %v798_v40  ;;  %v799_v42 = vpack.c.bf16 %v2415_v41, %v2414_v35  ;;  %v2418_v48 = vld [vmem:[%s4159_s3 + $0x1f0] sm:$0xff]  ;;  %v2419_v51 = vld [vmem:[%s4159_s3 + $0x1f8] sm:$0xff]  ;;  %v2420_v55 = vld [vmem:[%s4159_s3 + $0x200] sm:$0xff] }
 0x355   :  { %v1912_v4 = vpack.c.bf16 %v1908_v1, %v1907_v58  ;;  %v2922_v5 = vpop.permute.xlu1 %2921  ;;  %v1895_v14 = vsel %vm1372_vm3, %v1891_v9, %v2908_v57  ;;  %v1896_v13 = vsel %vm1372_vm3, %v1892_v8, %v2909_v56  ;;  %2130 = vmatprep.subr.bf16.mxu1 %v2972_v61  ;;  %v801_v54 = vpack.c.bf16 %v2419_v51, %v2418_v48  ;;  %v2421_v56 = vld [vmem:[%s4159_s3 + $0x208] sm:$0xff]  ;;  %v2422_v58 = vld [vmem:[%s4159_s3 + $0x210] sm:$0xff]  ;;  %v2423_v1 = vld [vmem:[%s4159_s3 + $0x218] sm:$0xff] }
 0x356   :  { %v2917_v6 = vpop.permute.xlu0 %2916  ;;  %v2924_v39 = vunpack.i.h.bf16 %v2922_v5  ;;  %v2923_v50 = vunpack.i.l.bf16 %v2922_v5  ;;  %v802_v57 = vpack.c.bf16 %v2421_v56, %v2420_v55  ;;  %v803_v2 = vpack.c.bf16 %v2423_v1, %v2422_v58  ;;  %v2427_v8 = vld [vmem:[%s4159_s3 + $0x238] sm:$0xff] }
 0x357   :  { %v2919_v10 = vunpack.i.h.bf16 %v2917_v6  ;;  %v2918_v12 = vunpack.i.l.bf16 %v2917_v6  ;;  %2450 = vmatprep.mubr.msk.bf16.mxu0 %vm1389_vm4, %v1912_v4  ;;  %v2425_v4 = vld [vmem:[%s4159_s3 + $0x228] sm:$0xff]  ;;  %v2426_v6 = vld [vmem:[%s4159_s3 + $0x230] sm:$0xff] }
 0x358   :  { %v1894_v19 = vsel %vm617_vm2, %v1786_v29, %v2924_v39  ;;  %v1893_v49 = vsel %vm617_vm2, %v1785_v59, %v2923_v50  ;;  %2131 = vmatpush1.bf16.msra.mxu1 %v799_v42  ;;  %v804_v5 = vpack.c.bf16 %v2425_v4, %v2424_v3  ;;  %v805_v9 = vpack.c.bf16 %v2427_v8, %v2426_v6  ;;  %v2432_v39 = vld [vmem:[%s4159_s3 + $0x260] sm:$0xff]  ;;  %v2433_v50 = vld [vmem:[%s4159_s3 + $0x268] sm:$0xff] }
 0x359   :  { %v1899_v38 = vsel %vm1389_vm4, %v1895_v14, %v2918_v12  ;;  %v1900_v37 = vsel %vm1389_vm4, %v1896_v13, %v2919_v10  ;;  %v2932_v0 = vpop.permute.xlu1 %2931  ;;  %2132 = vmatprep.subr.bf16.mxu1 %v2972_v61  ;;  %v2428_v10 = vld [vmem:[%s4159_s3 + $0x240] sm:$0xff]  ;;  %v2429_v12 = vld [vmem:[%s4159_s3 + $0x248] sm:$0xff]  ;;  %v2430_v13 = vld [vmem:[%s4159_s3 + $0x250] sm:$0xff] }
 0x35a   :  { %v1911_v15 = vpack.c.bf16 %v1900_v37, %v1899_v38  ;;  %v2927_v17 = vpop.permute.xlu0 %2926  ;;  %v2934_v11 = vunpack.i.h.bf16 %v2932_v0  ;;  %v2933_v18 = vunpack.i.l.bf16 %v2932_v0  ;;  %v806_v14 = vpack.c.bf16 %v2429_v12, %v2428_v10  ;;  %v2431_v38 = vld [vmem:[%s4159_s3 + $0x258] sm:$0xff]  ;;  %v2449_v0 = vld [vmem:[%s4160_s2 + $0x4] ss:$0 sm:$0xff]  ;;  %v31_v6 = vld [vmem:[%s4160_s2 + $0x5] sm:$0x1] }
 0x35b   :  { %v2929_v47 = vunpack.i.h.bf16 %v2927_v17  ;;  %v2928_v21 = vunpack.i.l.bf16 %v2927_v17  ;;  %v807_v37 = vpack.c.bf16 %v2431_v38, %v2430_v13  ;;  %v32_v10 = vld [vmem:[%s4160_s2 + $0x6] sm:$0x1] }
 0x35c   :  { %1958 = vmatmul.mubr.bf16.vlgmr.msra.gmra.mrb[28].mxu0 %v1911_v15  ;;  %v1897_v26 = vsel %vm1372_vm3, %v1893_v49, %v2933_v18  ;;  %v1898_v27 = vsel %vm1372_vm3, %v1894_v19, %v2934_v11  ;;  %2133 = vmatpush1.bf16.msra.mxu1 %v800_v46  ;;  %v808_v15 = vpack.c.bf16 %v2433_v50, %v2432_v39 }
 0x35d   :  { %v2942_v63 = vpop.permute.xlu1 %2941  ;;  %v1906_v28 = vsel %vm617_vm2, %v1802_v43, %v2929_v47  ;;  %v1905_v30 = vsel %vm617_vm2, %v1801_v23, %v2928_v21  ;;  %2134 = vmatprep.subr.bf16.mxu1 %v2972_v61 }
 0x35e   :  { %v2937_v16 = vpop.permute.xlu0 %2936  ;;  %v2944_v20 = vunpack.i.h.bf16 %v2942_v63  ;;  %v2943_v22 = vunpack.i.l.bf16 %v2942_v63 }
 0x35f   :  { %v2939_v24 = vunpack.i.h.bf16 %v2937_v16  ;;  %v2938_v25 = vunpack.i.l.bf16 %v2937_v16 }
 0x360   :  { %v1901_v32 = vsel %vm1389_vm4, %v1897_v26, %v2943_v22  ;;  %v1902_v33 = vsel %vm1389_vm4, %v1898_v27, %v2944_v20  ;;  %2135 = vmatpush1.bf16.msra.mxu1 %v801_v54 }
 0x361   :  { %v1909_v31 = vsel %vm1372_vm3, %v1905_v30, %v2938_v25  ;;  %v1910_v36 = vsel %vm1372_vm3, %v1906_v28, %v2939_v24  ;;  %v1913_v7 = vpack.c.bf16 %v1902_v33, %v1901_v32  ;;  %2136 = vmatprep.subr.bf16.mxu1 %v2972_v61 }
 0x362   :  { %v1914_v53 = vpack.c.bf16 %v1910_v36, %v1909_v31 }
 0x364   :  { %2451 = vmatprep.mubr.msk.bf16.mxu0 %vm1389_vm4, %v1914_v53  ;;  %2137 = vmatpush1.bf16.msra.mxu1 %v802_v57 }
 0x365   :  { %1966 = vmatmul.mubr.bf16.gmra.mrb[32].mxu0 %v1913_v7  ;;  %2138 = vmatprep.subr.bf16.mxu1 %v2972_v61 }
 0x366   :  { %2653 = vmatprep.mubr.msk.f32.mxu0 %vm2977_vm14, %v2971_v60 }
 0x368   :  { %2139 = vmatpush1.bf16.msra.mxu1 %v803_v2 }
 0x369   :  { %2140 = vmatprep.subr.bf16.mxu1 %v2972_v61 }
 0x36c   :  { %2141 = vmatpush1.bf16.msra.mxu1 %v804_v5 }
 0x36d   :  { %2142 = vmatprep.subr.bf16.mxu1 %v2972_v61 }
 0x370   :  { %2143 = vmatpush1.bf16.msra.mxu1 %v805_v9 }
 0x371   :  { %2144 = vmatprep.subr.bf16.mxu1 %v2972_v61 }
 0x374   :  { %2145 = vmatpush1.bf16.msra.mxu1 %v806_v14 }
 0x375   :  { %2146 = vmatprep.subr.bf16.mxu1 %v2972_v61 }
 0x378   :  { %2147 = vmatpush1.bf16.msra.mxu1 %v807_v37 }
 0x379   :  { %2148 = vmatprep.subr.bf16.mxu1 %v2972_v61 }
 0x37c   :  { %2149 = vmatpush1.bf16.msra.mxu1 %v808_v15 }
 0x37d   :  { %2150 = vmatprep.subr.bf16.mxu1 %v2972_v61 }
 0x42f   :  { %v1959_v17 = vpop.f32.mrb[28].mxu0 }
 0x430   :  { %v1960_v11 = vadd.f32 %v2449_v0, %v1959_v17  ;;  %v1961_v18 = vpop.f32.mrb[29].mxu0 }
 0x431   :  { %v1962_v47 = vpop.f32.mrb[30].mxu0 }
 0x432   :  { %v1988_v21 = vmul.f32 %v1960_v11, %v1960_v11  ;;  %v1963_v59 = vadd.f32 %v2449_v0, %v1962_v47  ;;  %v1964_v29 = vpop.f32.mrb[31].mxu0  ;;  %v1974_v19 = vsel %vm617_vm2, %v1960_v11, 0.0 }
 0x434   :  { %v1975_v49 = vsel %vm617_vm2, %v1963_v59, 0.0  ;;  %v1989_v63 = vmul.f32 %v1963_v59, %v1963_v59  ;;  %v1992_v23 = vsel %vm617_vm2, %v1988_v21, 0.0 }
 0x435   :  { %v1976_v16 = vadd.f32 %v1975_v49, %v1974_v19 }
 0x436   :  { %v1993_v43 = vsel %vm617_vm2, %v1989_v63, 0.0 }
 0x437   :  { %v1994_v20 = vadd.f32 %v1993_v43, %v1992_v23  ;;  %v2434_v23 = vld [vmem:[%s4159_s3 + $0x270] sm:$0xff]  ;;  %v2435_v43 = vld [vmem:[%s4159_s3 + $0x278] sm:$0xff] }
 0x438   :  { %v1967_v22 = vpop.f32.mrb[32].mxu0 }
 0x439   :  { %v1968_v24 = vadd.f32 %v2449_v0, %v1967_v22  ;;  %v1969_v25 = vpop.f32.mrb[33].mxu0  ;;  %v2436_v22 = vld [vmem:[%s4159_s3 + $0x280] sm:$0xff] }
 0x43a   :  { %v1970_v26 = vpop.f32.mrb[34].mxu0 }
 0x43b   :  { %v1977_v27 = vsel %vm617_vm2, %v1968_v24, 0.0  ;;  %v1990_v28 = vmul.f32 %v1968_v24, %v1968_v24  ;;  %v1971_v30 = vadd.f32 %v2449_v0, %v1970_v26  ;;  %v1972_v31 = vpop.f32.mrb[35].mxu0 }
 0x43c   :  { %v1978_v36 = vadd.f32 %v1977_v27, %v1976_v16 }
 0x43d   :  { %v1995_v32 = vsel %vm617_vm2, %v1990_v28, 0.0  ;;  %v1979_v33 = vsel %vm617_vm2, %v1971_v30, 0.0  ;;  %v1991_v53 = vmul.f32 %v1971_v30, %v1971_v30 }
 0x43e   :  { %v1996_v7 = vadd.f32 %v1995_v32, %v1994_v20  ;;  %v1980_v34 = vadd.f32 %v1979_v33, %v1978_v36  ;;  %v809_v20 = vpack.c.bf16 %v2435_v43, %v2434_v23  ;;  %v2230_v23 = vld [vmem:[%s4161_s4 + $0x18] sm:$0xff] }
 0x43f   :  { %v1997_v62 = vsel %vm617_vm2, %v1991_v53, 0.0 }
 0x440   :  { %v1981_v35 = vrot.slane %v1980_v34, 4  ;;  %v1998_v40 = vadd.f32 %v1997_v62, %v1996_v7  ;;  %2151 = vmatpush1.bf16.msra.mxu1 %v809_v20  ;;  %v2439_v62 = vld [vmem:[%s4159_s3 + $0x298] sm:$0xff]  ;;  %v2231_v20 = vld [vmem:[%s4161_s4 + $0x20] sm:$0xff] }
 0x441   :  { %2152 = vmatprep.subr.bf16.mxu1 %v2972_v61 }
 0x442   :  { %v1982_v41 = vadd.f32 %v1981_v35, %v1980_v34  ;;  %v1999_v42 = vrot.slane %v1998_v40, 4  ;;  %v2438_v34 = vld [vmem:[%s4159_s3 + $0x290] sm:$0xff] }
 0x444   :  { %v1983_v44 = vrot.slane %v1982_v41, 2  ;;  %v2000_v45 = vadd.f32 %v1999_v42, %v1998_v40 }
 0x446   :  { %v1984_v46 = vadd.f32 %v1983_v44, %v1982_v41  ;;  %v2001_v48 = vrot.slane %v2000_v45, 2  ;;  %v811_v41 = vpack.c.bf16 %v2439_v62, %v2438_v34 }
 0x448   :  { %v1985_v51 = vrot.slane %v1984_v46, 1  ;;  %v2002_v54 = vadd.f32 %v2001_v48, %v2000_v45 }
 0x44a   :  { %v1986_v55 = vadd.f32 %v1985_v51, %v1984_v46  ;;  %v2003_v56 = vrot.slane %v2002_v54, 1 }
 0x44c   :  { %v1987_v57 = vmul.f32 0.03125, %v1986_v55  ;;  %v2004_v58 = vadd.f32 %v2003_v56, %v2002_v54 }
 0x44e   :  { %v2005_v1 = vmul.f32 0.03125, %v2004_v58  ;;  %v2006_v2 = vmul.f32 %v1987_v57, %v1987_v57 }
 0x450   :  { %v2007_v3 = vsub.f32 %v2005_v1, %v2006_v2 }
 0x452   :  { %v2008_v4 = vmax.f32 %v2007_v3, 0.0 }
 0x454   :  { %v2009_v5 = vadd.f32 1e-05, %v2008_v4 }
 0x456   :  { %2967 = vrsqrt.f32 %v2009_v5 }
 0x460   :  { %v2968_v8 = vpop.eup %2967 }
 0x461   :  { %v2011_v9 = vmul.f32 %v2968_v8, %v31_v6 }
 0x463   :  { %v2012_v12 = vmul.f32 %v2011_v9, %v1987_v57  ;;  %v2017_v14 = vrot.slane %v2011_v9, %v3835_v52 }
 0x465   :  { %v2013_v13 = vsub.f32 %v32_v10, %v2012_v12  ;;  %v2018_v38 = vmul.f32 %v2017_v14, %v1960_v11  ;;  %v2019_v37 = vmul.f32 %v2017_v14, %v1963_v59  ;;  %v2020_v39 = vmul.f32 %v2017_v14, %v1968_v24  ;;  %v2437_v24 = vld [vmem:[%s4159_s3 + $0x288] sm:$0xff] }
 0x466   :  { %v2021_v50 = vmul.f32 %v2017_v14, %v1971_v30  ;;  %v810_v25 = vpack.c.bf16 %v2437_v24, %v2436_v22  ;;  %v2232_v22 = vld [vmem:[%s4161_s4 + $0x28] sm:$0xff] }
 0x467   :  { %v2025_v15 = vrot.slane %v2013_v13, %v3835_v52  ;;  %v2667_v24 = vpack.c.bf16 %v2232_v22, %v2231_v20 }
 0x468   :  { %2153 = vmatpush1.bf16.msra.mxu1 %v810_v25  ;;  %v2233_v25 = vld [vmem:[%s4161_s4 + $0x30] sm:$0xff] }
 0x469   :  { %v2026_v0 = vadd.f32 %v2025_v15, %v2018_v38  ;;  %v2027_v17 = vadd.f32 %v2025_v15, %v2019_v37  ;;  %v2028_v18 = vadd.f32 %v2025_v15, %v2020_v39  ;;  %v2029_v47 = vadd.f32 %v2025_v15, %v2021_v50  ;;  %2154 = vmatprep.subr.bf16.mxu1 %v2972_v61 }
 0x46b   :  { %vm2030_vm8 = vcmp.gt.f32.partialorder %v2026_v0, 0.0  ;;  %vm2031_vm9 = vcmp.gt.f32.partialorder %v2027_v17, 0.0  ;;  %vm2032_vm10 = vcmp.gt.f32.partialorder %v2028_v18, 0.0  ;;  %vm2033_vm11 = vcmp.gt.f32.partialorder %v2029_v47, 0.0 }
 0x46c   :  { %v2034_v21 = vmul.f32 0.2, %v2026_v0  ;;  %v2035_v29 = vmul.f32 0.2, %v2027_v17  ;;  %v2036_v19 = vmul.f32 0.2, %v2028_v18  ;;  %2155 = vmatpush1.bf16.msra.mxu1 %v811_v41 }
 0x46d   :  { %v2037_v49 = vmul.f32 0.2, %v2029_v47 }
 0x46e   :  { %v2038_v63 = vsel %vm2030_vm8, %v2026_v0, %v2034_v21  ;;  %v2039_v16 = vsel %vm2031_vm9, %v2027_v17, %v2035_v29  ;;  %v2040_v11 = vsel %vm2032_vm10, %v2028_v18, %v2036_v19 }
 0x46f   :  { %v2041_v59 = vsel %vm2033_vm11, %v2029_v47, %v2037_v49  ;;  %2042 = vst.msk [vmem:[#allocation2 + $0x8] sm:$0xff] %vm617_vm2, %v2038_v63  ;;  %2043 = vst.msk [vmem:[#allocation2 + $0x10] sm:$0xff] %vm617_vm2, %v2039_v16  ;;  %v2976_v49 = vmov 0.0|0.0   ;;  %v2227_v63 = vld [vmem:[%s4161_s4] sm:$0xff]  ;;  %v2228_v16 = vld [vmem:[%s4161_s4 + $0x8] sm:$0xff] }
 0x470   :  { %2044 = vst.msk [vmem:[#allocation2 + $0x110] sm:$0xff] %vm617_vm2, %v2040_v11  ;;  %2045 = vst.msk [vmem:[#allocation2 + $0x118] sm:$0xff] %vm617_vm2, %v2041_v59  ;;  %2660 = vmatprep.subr.bf16.mxu0 %v2976_v49  ;;  %v2229_v11 = vld [vmem:[%s4161_s4 + $0x10] sm:$0xff]  ;;  %v2661_v59 = vpack.c.bf16 %v2228_v16, %v2227_v63 }
 0x471   :  { %v2664_v43 = vpack.c.bf16 %v2230_v23, %v2229_v11 }
 0x472   :  { %2662 = vmatpush3.bf16.msra.mxu0 %v2661_v59 }
 0x473   :  { %2663 = vmatprep.subr.bf16.mxu0 %v2976_v49 }
 0x476   :  { %v2048_v32 = vld [vmem:[#allocation2 + $0x6] ss:$4 sm:$0xf]  ;;  %v2050_v35 = vld [vmem:[#allocation2 + $0x7] ss:$4 sm:$0xf]  ;;  %2665 = vmatpush3.bf16.msra.mxu0 %v2664_v43 }
 0x477   :  { %v2051_v26 = vld [vmem:[#allocation2 + $0x10f] ss:$4 sm:$0xf]  ;;  %v2049_v30 = vld [vmem:[#allocation2 + $0x10e] ss:$4 sm:$0xf]  ;;  %2666 = vmatprep.subr.bf16.mxu0 %v2976_v49 }
 0x478   :  { %v2059_v27 = vld [vmem:[#allocation2 + $0x113] ss:$4 sm:$0xf]  ;;  %v2057_v31 = vld [vmem:[#allocation2 + $0x112] ss:$4 sm:$0xf] }
 0x479   :  { %v2950_v28 = vpack.i.bf16 %v2059_v27, %v2051_v26  ;;  %v2945_v36 = vpack.i.bf16 %v2057_v31, %v2049_v30  ;;  %v2056_v33 = vld [vmem:[#allocation2 + $0xa] ss:$4 sm:$0xf]  ;;  %v2053_v53 = vld [vmem:[#allocation2 + $0x110] ss:$4 sm:$0xf] }
 0x47a   :  { %v2955_v7 = vpack.i.bf16 %v2056_v33, %v2048_v32  ;;  %v2058_v40 = vld [vmem:[#allocation2 + $0xb] ss:$4 sm:$0xf]  ;;  %v2052_v61 = vld [vmem:[#allocation2 + $0x8] ss:$4 sm:$0xf]  ;;  %2668 = vmatpush3.bf16.msra.mxu0 %v2667_v24 }
 0x47b   :  { %2951 = vrot.lane.b32.xlu1 %v2950_v28, %s2973_s15  ;;  %2946 = vrot.lane.b32.xlu0 %v2945_v36, %s2974_s16  ;;  %v2960_v42 = vpack.i.bf16 %v2058_v40, %v2050_v35  ;;  %v2047_v54 = vld [vmem:[#allocation2 + $0x10d] ss:$4 sm:$0xf]  ;;  %v2235_v28 = vld [vmem:[%s4161_s4 + $0x40] sm:$0xff] }
 0x47c   :  { %v2055_v56 = vld [vmem:[#allocation2 + $0x111] ss:$4 sm:$0xf]  ;;  %2669 = vmatprep.subr.bf16.mxu0 %v2976_v49  ;;  %v2236_v30 = vld [vmem:[%s4161_s4 + $0x48] sm:$0xff] }
 0x47d   :  { %v2054_v9 = vld [vmem:[#allocation2 + $0x9] ss:$4 sm:$0xf]  ;;  %v2234_v26 = vld [vmem:[%s4161_s4 + $0x38] sm:$0xff]  ;;  %v2673_v31 = vpack.c.bf16 %v2236_v30, %v2235_v28 }
 0x47e   :  { %v2046_v12 = vld [vmem:[#allocation2 + $0x5] ss:$4 sm:$0xf]  ;;  %v2670_v27 = vpack.c.bf16 %v2234_v26, %v2233_v25  ;;  %v2238_v32 = vld [vmem:[%s4161_s4 + $0x58] sm:$0xff] }
 0x47f   :  { %2080 = vrot.lane.b32.xlu1 %v2053_v53, %s2975_s21  ;;  %2956 = vrot.lane.b32.xlu0 %v2955_v7, %s2974_s16  ;;  %v2237_v36 = vld [vmem:[%s4161_s4 + $0x50] sm:$0xff]  ;;  %v2452_v53 = vld [vmem:[%s4160_s2 + $0x7] ss:$0 sm:$0xff] }
 0x480   :  { %2671 = vmatpush3.bf16.msra.mxu0 %v2670_v27  ;;  %v2676_v33 = vpack.c.bf16 %v2238_v32, %v2237_v36 }
 0x481   :  { %2672 = vmatprep.subr.bf16.mxu0 %v2976_v49 }
 0x483   :  { %2078 = vrot.lane.b32.xlu1 %v2052_v61, %s2975_s21  ;;  %2961 = vrot.lane.b32.xlu0 %v2960_v42, %s2973_s15 }
 0x484   :  { %2674 = vmatpush3.bf16.msra.mxu0 %v2673_v31 }
 0x485   :  { %2675 = vmatprep.subr.bf16.mxu0 %v2976_v49 }
 0x488   :  { %2677 = vmatpush3.bf16.msra.mxu0 %v2676_v33 }
 0x489   :  { %2678 = vmatprep.subr.bf16.mxu0 %v2976_v49 }
 0x4ed   :  { %v2952_v44 = vpop.permute.xlu1 %2951  ;;  %v2947_v45 = vpop.permute.xlu0 %2946 }
 0x4ee   :  { %v2953_v46 = vunpack.i.l.bf16 %v2952_v44  ;;  %v2949_v48 = vunpack.i.h.bf16 %v2947_v45  ;;  %v2948_v51 = vunpack.i.l.bf16 %v2947_v45  ;;  %v2954_v55 = vunpack.i.h.bf16 %v2952_v44 }
 0x4f0   :  { %v2101_v57 = vsel %vm617_vm2, %v2047_v54, %v2948_v51  ;;  %v2107_v58 = vsel %vm617_vm2, %v2055_v56, %v2949_v48 }
 0x4f1   :  { %v2957_v1 = vpop.permute.xlu0 %2956  ;;  %v2081_v2 = vpop.permute.xlu1 %2080  ;;  %v2103_v3 = vsel %vm1372_vm3, %v2101_v57, %v2953_v46  ;;  %v2109_v6 = vsel %vm1372_vm3, %v2107_v58, %v2954_v55 }
 0x4f2   :  { %v2959_v4 = vunpack.i.h.bf16 %v2957_v1  ;;  %v2958_v5 = vunpack.i.l.bf16 %v2957_v1  ;;  %v2105_v8 = vsel %vm1389_vm4, %v2103_v3, %v2081_v2  ;;  %v2113_v38 = vrot.slane %v2109_v6, 4 }
 0x4f3   :  { %v2112_v50 = vrot.slane %v2105_v8, 4 }
 0x4f4   :  { %v2106_v37 = vsel %vm617_vm2, %v2054_v9, %v2959_v4  ;;  %v2100_v39 = vsel %vm617_vm2, %v2046_v12, %v2958_v5 }
 0x4f5   :  { %v2962_v10 = vpop.permute.xlu0 %2961  ;;  %v2079_v15 = vpop.permute.xlu1 %2078 }
 0x4f6   :  { %v2964_v14 = vunpack.i.h.bf16 %v2962_v10  ;;  %v2963_v13 = vunpack.i.l.bf16 %v2962_v10  ;;  %v34_v10 = vld [vmem:[%s4160_s2 + $0x8] sm:$0x1] }
 0x4f8   :  { %v2102_v0 = vsel %vm1372_vm3, %v2100_v39, %v2963_v13  ;;  %v2108_v17 = vsel %vm1372_vm3, %v2106_v37, %v2964_v14  ;;  %v35_v13 = vld [vmem:[%s4160_s2 + $0x9] sm:$0x1]  ;;  %v2239_v39 = vld [vmem:[%s4161_s4 + $0x60] sm:$0xff] }
 0x4f9   :  { %v2104_v18 = vsel %vm1389_vm4, %v2102_v0, %v2079_v15  ;;  %v2118_v47 = vsel %vm2116_vm12, %v2108_v17, %v2113_v38 }
 0x4fa   :  { %v2120_v21 = vpack.c.bf16 %v2118_v47, %v2118_v47  ;;  %v2117_v29 = vsel %vm2116_vm12, %v2104_v18, %v2112_v50  ;;  %v2240_v50 = vld [vmem:[%s4161_s4 + $0x68] sm:$0xff] }
 0x4fb   :  { %v2119_v19 = vpack.c.bf16 %v2117_v29, %v2117_v29  ;;  %v2679_v15 = vpack.c.bf16 %v2240_v50, %v2239_v39  ;;  %v2242_v29 = vld [vmem:[%s4161_s4 + $0x78] sm:$0xff] }
 0x4fc   :  { %2453 = vmatprep.mubr.msk.bf16.mxu1 %vm1389_vm4, %v2120_v21  ;;  %v2241_v21 = vld [vmem:[%s4161_s4 + $0x70] sm:$0xff] }
 0x4fd   :  { %2161 = vmatmul.mubr.bf16.vlgmr.msra.gmra.mrb[60].mxu1 %v2119_v19  ;;  %2680 = vmatpush3.bf16.msra.mxu0 %v2679_v15  ;;  %v2682_v63 = vpack.c.bf16 %v2242_v29, %v2241_v21 }
 0x4fe   :  { %2681 = vmatprep.subr.bf16.mxu0 %v2976_v49 }
 0x501   :  { %2683 = vmatpush3.bf16.msra.mxu0 %v2682_v63 }
 0x5d0   :  { %v2162_v7 = vpop.f32.mrb[60].mxu1 }
 0x5d1   :  { %v2163_v34 = vadd.f32 %v2452_v53, %v2162_v7  ;;  %v2164_v62 = vpop.f32.mrb[61].mxu1 }
 0x5d2   :  { %v2165_v35 = vpop.f32.mrb[62].mxu1 }
 0x5d3   :  { %v2168_v40 = vsel %vm617_vm2, %v2163_v34, 0.0  ;;  %v2176_v41 = vmul.f32 %v2163_v34, %v2163_v34  ;;  %v2166_v61 = vpop.f32.mrb[63].mxu1 }
 0x5d4   :  { %v2169_v42 = vrot.slane %v2168_v40, 4 }
 0x5d5   :  { %v2177_v44 = vsel %vm617_vm2, %v2176_v41, 0.0 }
 0x5d6   :  { %v2170_v45 = vadd.f32 %v2169_v42, %v2168_v40  ;;  %v2178_v46 = vrot.slane %v2177_v44, 4 }
 0x5d8   :  { %v2171_v48 = vrot.slane %v2170_v45, 2  ;;  %v2179_v51 = vadd.f32 %v2178_v46, %v2177_v44 }
 0x5da   :  { %v2172_v54 = vadd.f32 %v2171_v48, %v2170_v45  ;;  %v2180_v55 = vrot.slane %v2179_v51, 2 }
 0x5dc   :  { %v2173_v56 = vrot.slane %v2172_v54, 1  ;;  %v2181_v57 = vadd.f32 %v2180_v55, %v2179_v51 }
 0x5de   :  { %v2174_v58 = vadd.f32 %v2173_v56, %v2172_v54  ;;  %v2182_v1 = vrot.slane %v2181_v57, 1 }
 0x5e0   :  { %v2175_v2 = vmul.f32 0.125, %v2174_v58  ;;  %v2183_v3 = vadd.f32 %v2182_v1, %v2181_v57 }
 0x5e2   :  { %v2184_v4 = vmul.f32 0.125, %v2183_v3  ;;  %v2185_v5 = vmul.f32 %v2175_v2, %v2175_v2 }
 0x5e4   :  { %v2186_v6 = vsub.f32 %v2184_v4, %v2185_v5 }
 0x5e6   :  { %v2187_v8 = vmax.f32 %v2186_v6, 0.0 }
 0x5e8   :  { %v2188_v9 = vadd.f32 1e-05, %v2187_v8 }
 0x5ea   :  { %2969 = vrsqrt.f32 %v2188_v9 }
 0x5f4   :  { %v2970_v12 = vpop.eup %2969 }
 0x5f5   :  { %v2190_v14 = vmul.f32 %v2970_v12, %v34_v10 }
 0x5f7   :  { %v2191_v38 = vmul.f32 %v2190_v14, %v2175_v2  ;;  %v2196_v37 = vrot.slane %v2190_v14, %v3835_v52 }
 0x5f9   :  { %v2192_v0 = vsub.f32 %v35_v13, %v2191_v38  ;;  %v2197_v17 = vmul.f32 %v2196_v37, %v2163_v34 }
 0x5fb   :  { %v2201_v18 = vrot.slane %v2192_v0, %v3835_v52  ;;  %v11_v52 = vstv %s4162_s5 }
 0x5fc   :  { %12 = vst [vmem:[#allocation3] sm:$0x1] %v11_v52 }
 0x5fd   :  { %v2202_v47 = vadd.f32 %v2201_v18, %v2197_v17 }
 0x5ff   :  { %v2204_v19 = vmul.f32 0.2, %v2202_v47  ;;  %vm2203_vm13 = vcmp.gt.f32.partialorder %v2202_v47, 0.0 }
 0x601   :  { %v2205_v49 = vsel %vm2203_vm13, %v2202_v47, %v2204_v19 }
 0x602   :  { %v2211_v16 = vrot.slane %v2205_v49, 2  ;;  %v2207_v11 = vrot.slane %v2205_v49, 1  ;;  %v2215_v59 = vrot.slane %v2205_v49, 3 }
 0x603   :  { %v2454_v27 = vld [vmem:[#allocation3] ss:$0 sm:$0xff] }
 0x604   :  { %2212 = vrot.lane.b32.xlu1 %v2211_v16, %s2973_s15  ;;  %2208 = vrot.lane.b32.xlu0 %v2207_v11, %s2974_s16 }
 0x608   :  { %2216 = vrot.lane.b32.xlu0 %v2215_v59, %s2975_s21 }
 0x676   :  { %v2209_v23 = vpop.permute.xlu0 %2208  ;;  %v2213_v43 = vpop.permute.xlu1 %2212 }
 0x677   :  { %v2219_v60 = vsel %vm617_vm2, %v2205_v49, %v2209_v23 }
 0x678   :  { %v2220_v20 = vsel %vm1372_vm3, %v2219_v60, %v2213_v43 }
 0x67a   :  { %v2217_v22 = vpop.permute.xlu0 %2216 }
 0x67b   :  { %v2221_v24 = vsel %vm1389_vm4, %v2220_v20, %v2217_v22 }
 0x67c   :  { %v2223_v25 = vrot.slane %v2221_v24, 3 }
 0x67e   :  { %v2226_v26 = vsel %vm2225_vm15, %v2221_v24, %v2223_v25 }
 0x67f   :  { %2654 = vmatmul.mubr.f32.vlgmr.msra.gmra.mrb[36].mxu0 %v2226_v26 }
 0x752   :  { %v2316_v28 = vpop.f32.mrb[36].mxu0 }
 0x753   :  { %v2317_v30 = vadd.f32 %v2454_v27, %v2316_v28  ;;  %v2655_v31 = vpop.f32.mrb[37].mxu0 }
 0x755   :  { %2321 = vst.msk [vmem:[%s4163_s6] sm:$0x3] %vm2320_vm0, %v2317_v30 }

</bundles_post_ra>
